<compile_context>
chip_gen: v7x
topology: tpu7x:2x2x1
jax: 0.10.0
libtpu: 0.0.40
codegen_flags: <defaults>
</compile_context>

<pallas_src>
import math
import numpy as np
import jax
import jax.numpy as jnp
from jax import lax
from jax.experimental import pallas as pl
from jax.experimental.pallas import tpu as pltpu


# --------------------------------------------------------------------------
# Fused kernel: grid = (batch, layer).  One decoder layer per grid step.
# --------------------------------------------------------------------------
def decoder_kernel(x_ref, cos_ref, sin_ref, mask_ref,
                   wq_ref, wk_ref, wv_ref, wo_ref,
                   w1_ref, b1_ref, w2_ref, vecs_ref,
                   w_out_ref, b_out_ref,
                   o_ref, x_scr):
    l = pl.program_id(1)
    n_layers = pl.num_programs(1)
    S, D = x_scr.shape
    half = D // 2

    # Load the embedding output once (layer 0); afterwards the activation
    # stays resident in VMEM scratch -> no HBM round-trip between layers.
    @pl.when(l == 0)
    def _():
        x_scr[...] = x_ref[...]

    x = x_scr[...]                           # (S, D) f32
    cosf = cos_ref[...]                      # (S, D/2)
    sinf = sin_ref[...]                      # (S, D/2)
    masked = mask_ref[...] == 0.0            # (S, S) bool

    vec = vecs_ref[...]                      # (9, D) packed small vectors
    bq, bk, bv = vec[0:1], vec[1:2], vec[2:3]
    bo, b2 = vec[3:4], vec[4:5]
    g1, be1, g2, be2 = vec[5:6], vec[6:7], vec[7:8], vec[8:9]

    def mxu(a_bf16, w_ref):
        # bf16 operands, f32 accumulation on the MXU
        return jnp.dot(a_bf16, w_ref[...], preferred_element_type=jnp.float32)

    def layer_norm(t, g, b):
        mu = jnp.mean(t, axis=-1, keepdims=True)
        var = jnp.mean((t - mu) ** 2, axis=-1, keepdims=True)
        return (t - mu) * lax.rsqrt(var + 1e-5) * g + b

    def rope(t):
        # Weights are column-permuted to [even dims | odd dims], so the
        # interleaved rotary of the reference becomes a half-split rotation.
        t1, t2 = t[:, :half], t[:, half:]
        return jnp.concatenate([t1 * cosf - t2 * sinf,
                                t1 * sinf + t2 * cosf], axis=1)

    # ---- self-attention for this batch element (S x S, not (BS)x(BS)) ----
    xb = x.astype(jnp.bfloat16)              # single f32->bf16 cast of x
    q = mxu(xb, wq_ref) + bq                 # 1/sqrt(d_k) pre-folded into wq/bq
    k = mxu(xb, wk_ref) + bk
    v = mxu(xb, wv_ref) + bv

    q = rope(q)
    k = rope(k)

    # tiny (S,S) matmuls kept in f32 for accuracy (weight matmuls dominate)
    scores = lax.dot_general(q, k, (((1,), (1,)), ((), ())),
                             preferred_element_type=jnp.float32)    # (S, S)
    scores = jnp.where(masked, jnp.float32(-1e9), scores)
    m = jnp.max(scores, axis=-1, keepdims=True)
    e = jnp.exp(scores - m)
    p = e * pl.reciprocal(jnp.sum(e, axis=-1, keepdims=True), approx=True)
    attn = jnp.dot(p, v, preferred_element_type=jnp.float32)        # (S, D)
    attn = mxu(attn.astype(jnp.bfloat16), wo_ref) + bo

    x1 = layer_norm(x + attn, g1, be1)

    # ---- feed forward ----
    x1b = x1.astype(jnp.bfloat16)
    h = jnp.maximum(mxu(x1b, w1_ref) + b1_ref[...], 0.0)
    ff = mxu(h.astype(jnp.bfloat16), w2_ref) + b2
    x2 = layer_norm(x1 + ff, g2, be2)

    x_scr[...] = x2

    # ---- fc_out into a lane-dense (S, Vpad) block after the last layer ----
    @pl.when(l == n_layers - 1)
    def _():
        o_ref[...] = mxu(x2.astype(jnp.bfloat16), w_out_ref) + b_out_ref[...]


# --------------------------------------------------------------------------
# Wrapper
# --------------------------------------------------------------------------
def transformer_decoder_forward(tgt, position_ids, mask, emb, layers, w_out,
                                b_out, d_model):
    B, S = tgt.shape
    D = d_model
    half = D // 2
    L = len(layers)
    F = layers[0]["w1"].shape[1]
    V = w_out.shape[1]

    # TODO(synk): embedding token gather stays in XLA (tiny, irregular access);
    # everything downstream runs inside the single fused kernel.
    x = emb[tgt].astype(jnp.float32)                                  # (B, S, D)

    # rotary tables, passed once as (S, D/2)
    theta = 10000.0 ** (-2.0 * jnp.arange(half, dtype=jnp.float32) / D)
    ang = position_ids.astype(jnp.float32)[:, None] * theta           # (S, D/2)
    cosf, sinf = jnp.cos(ang), jnp.sin(ang)

    maskf = mask.astype(jnp.float32)                                  # (S, S)

    # column permutation putting even feature dims first, odd second
    perm = np.concatenate([np.arange(0, D, 2), np.arange(1, D, 2)])
    inv_sqrt_dk = 1.0 / math.sqrt(D)          # d_k == d_model (num_heads == 1)

    # per-layer weights stacked along a leading layer axis (streamed by the
    # BlockSpec index_map over the layer grid dimension, bf16 at the MXU)
    wq = jnp.stack([p["wq"][:, perm] * inv_sqrt_dk for p in layers]).astype(jnp.bfloat16)
    wk = jnp.stack([p["wk"][:, perm] for p in layers]).astype(jnp.bfloat16)
    wv = jnp.stack([p["wv"] for p in layers]).astype(jnp.bfloat16)
    wo = jnp.stack([p["wo"] for p in layers]).astype(jnp.bfloat16)
    w1 = jnp.stack([p["w1"] for p in layers]).astype(jnp.bfloat16)
    b1 = jnp.stack([p["b1"] for p in layers])                          # (L,1,F)
    w2 = jnp.stack([p["w2"] for p in layers]).astype(jnp.bfloat16)
    vecs = jnp.stack([jnp.concatenate(
        [p["bq"][:, perm] * inv_sqrt_dk, p["bk"][:, perm], p["bv"],
         p["bo"], p["b2"], p["g1"], p["be1"], p["g2"], p["be2"]], axis=0)
        for p in layers])                                              # (L,9,D)

    # lane-dense fc_out: pad vocab to a multiple of 128
    Vpad = pl.cdiv(V, 128) * 128
    w_out_p = jnp.pad(w_out, ((0, 0), (0, Vpad - V))).astype(jnp.bfloat16)
    b_out_p = jnp.pad(b_out, ((0, 0), (0, Vpad - V)))

    grid = (B, L)
    per_layer = lambda shape: pl.BlockSpec(shape, lambda b, l: (l, 0, 0))
    shared = lambda shape: pl.BlockSpec(shape, lambda b, l: (0, 0))

    out = pl.pallas_call(
        decoder_kernel,
        out_shape=jax.ShapeDtypeStruct((B, S, Vpad), jnp.float32),
        grid_spec=pltpu.PrefetchScalarGridSpec(
            num_scalar_prefetch=0,
            grid=grid,
            in_specs=[
                pl.BlockSpec((None, S, D), lambda b, l: (b, 0, 0)),    # x (per batch)
                shared((S, half)),                                     # cos
                shared((S, half)),                                     # sin
                shared((S, S)),                                        # mask
                per_layer((None, D, D)),                               # wq
                per_layer((None, D, D)),                               # wk
                per_layer((None, D, D)),                               # wv
                per_layer((None, D, D)),                               # wo
                per_layer((None, D, F)),                               # w1
                per_layer((None, 1, F)),                               # b1
                per_layer((None, F, D)),                               # w2
                per_layer((None, 9, D)),                               # vecs
                shared((D, Vpad)),                                     # w_out
                shared((1, Vpad)),                                     # b_out
            ],
            out_specs=pl.BlockSpec((None, S, Vpad), lambda b, l: (b, 0, 0)),
            scratch_shapes=[pltpu.VMEM((S, D), jnp.float32)],
        ),
        compiler_params=pltpu.CompilerParams(
            dimension_semantics=("parallel", "arbitrary"),
            vmem_limit_bytes=32 * 1024 * 1024,
        ),
    )(x, cosf, sinf, maskf, wq, wk, wv, wo, w1, b1, w2, vecs, w_out_p, b_out_p)

    return out[:, :, :V]


# --------------------------------------------------------------------------
# Pure-JAX reference (mirrors the PyTorch forward, eval mode)
# --------------------------------------------------------------------------
def reference_forward(tgt, position_ids, mask, emb, layers, w_out, b_out, d_model):
    x = emb[tgt].astype(jnp.float32)
    half = d_model // 2
    theta = 10000.0 ** (-2.0 * jnp.arange(half, dtype=jnp.float32) / d_model)
    ang = position_ids.astype(jnp.float32)[:, None] * theta
    c, s = jnp.cos(ang), jnp.sin(ang)

    def rot(t):
        te, to = t[..., 0::2], t[..., 1::2]
        out = jnp.zeros_like(t)
        out = out.at[..., 0::2].set(te * c - to * s)
        out = out.at[..., 1::2].set(te * s + to * c)
        return out

    def ln(t, g, b):
        mu = t.mean(-1, keepdims=True)
        var = ((t - mu) ** 2).mean(-1, keepdims=True)
        return (t - mu) / jnp.sqrt(var + 1e-5) * g[0] + b[0]

    for p in layers:
        q = rot(x @ p["wq"] + p["bq"][0])
        k = rot(x @ p["wk"] + p["bk"][0])
        v = x @ p["wv"] + p["bv"][0]
        scores = jnp.einsum("bqd,bkd->bqk", q, k) / math.sqrt(d_model)
        scores = jnp.where(mask == 0, -1e9, scores)
        attn = jax.nn.softmax(scores, axis=-1) @ v
        attn = attn @ p["wo"] + p["bo"][0]
        x = ln(x + attn, p["g1"], p["be1"])
        h = jax.nn.relu(x @ p["w1"] + p["b1"][0])
        x = ln(x + h @ p["w2"] + p["b2"][0], p["g2"], p["be2"])
    return x @ w_out + b_out[0]


# --------------------------------------------------------------------------
# Deterministic parameter construction + run
# --------------------------------------------------------------------------
def make_params(key, vocab_size, d_model, d_ff, num_layers):
    keys = jax.random.split(key, 2 + num_layers)
    emb = jax.random.normal(keys[0], (vocab_size, d_model), jnp.float32)
    layers = []
    for li in range(num_layers):
        ks = jax.random.split(keys[2 + li], 12)
        scale = 0.1
        layers.append(dict(
            wq=scale * jax.random.normal(ks[0], (d_model, d_model), jnp.float32),
            bq=scale * jax.random.normal(ks[1], (1, d_model), jnp.float32),
            wk=scale * jax.random.normal(ks[2], (d_model, d_model), jnp.float32),
            bk=scale * jax.random.normal(ks[3], (1, d_model), jnp.float32),
            wv=scale * jax.random.normal(ks[4], (d_model, d_model), jnp.float32),
            bv=scale * jax.random.normal(ks[5], (1, d_model), jnp.float32),
            wo=scale * jax.random.normal(ks[6], (d_model, d_model), jnp.float32),
            bo=scale * jax.random.normal(ks[7], (1, d_model), jnp.float32),
            w1=scale * jax.random.normal(ks[8], (d_model, d_ff), jnp.float32),
            b1=scale * jax.random.normal(ks[9], (1, d_ff), jnp.float32),
            w2=scale * jax.random.normal(ks[10], (d_ff, d_model), jnp.float32),
            b2=scale * jax.random.normal(ks[11], (1, d_model), jnp.float32),
            g1=jnp.ones((1, d_model), jnp.float32),
            be1=jnp.zeros((1, d_model), jnp.float32),
            g2=jnp.ones((1, d_model), jnp.float32),
            be2=jnp.zeros((1, d_model), jnp.float32),
        ))
    w_out = 0.1 * jax.random.normal(keys[1], (d_model, vocab_size), jnp.float32)
    b_out = jnp.zeros((1, vocab_size), jnp.float32)
    return emb, layers, w_out, b_out


if __name__ == "__main__":
    vocab_size, d_model, d_ff, num_layers = 64, 32, 64, 2
    num_heads = 1          # rotary broadcast in the reference requires d_k == d_model
    B, S = 2, 8

    key = jax.random.PRNGKey(0)
    kp, kt = jax.random.split(key)
    emb, layers, w_out, b_out = make_params(kp, vocab_size, d_model, d_ff, num_layers)

    tgt = jax.random.randint(kt, (B, S), 0, vocab_size, jnp.int32)
    position_ids = jnp.arange(S, dtype=jnp.int32)
    tgt_mask = jnp.tril(jnp.ones((S, S), jnp.float32))            # causal mask

    out = transformer_decoder_forward(tgt, position_ids, tgt_mask, emb, layers,
                                      w_out, b_out, d_model)
    out = jax.block_until_ready(out)

    ref = reference_forward(tgt, position_ids, tgt_mask, emb, layers,
                            w_out, b_out, d_model)
    assert out.shape == (B, S, vocab_size)
    assert np.allclose(np.asarray(out), np.asarray(ref), atol=2e-2, rtol=2e-2)
    print("KERNEL_OK")
</pallas_src>

<mosaic_0001>
module attributes {stable_mosaic.version = 11 : i64} {
  func.func @decoder_kernel(%arg0: i32, %arg1: i32, %arg2: memref<1x8x32xf32, #tpu.memory_space<vmem>>, %arg3: memref<8x16xf32, #tpu.memory_space<vmem>>, %arg4: memref<8x16xf32, #tpu.memory_space<vmem>>, %arg5: memref<8x8xf32, #tpu.memory_space<vmem>>, %arg6: memref<1x32x32xbf16, #tpu.memory_space<vmem>>, %arg7: memref<1x32x32xbf16, #tpu.memory_space<vmem>>, %arg8: memref<1x32x32xbf16, #tpu.memory_space<vmem>>, %arg9: memref<1x32x32xbf16, #tpu.memory_space<vmem>>, %arg10: memref<1x32x64xbf16, #tpu.memory_space<vmem>>, %arg11: memref<1x1x64xf32, #tpu.memory_space<vmem>>, %arg12: memref<1x64x32xbf16, #tpu.memory_space<vmem>>, %arg13: memref<1x9x32xf32, #tpu.memory_space<vmem>>, %arg14: memref<32x128xbf16, #tpu.memory_space<vmem>>, %arg15: memref<1x128xf32, #tpu.memory_space<vmem>>, %arg16: memref<1x8x128xf32, #tpu.memory_space<vmem>>, %arg17: memref<8x32xf32, #tpu.memory_space<vmem>>) attributes {dimension_semantics = [#tpu.dimension_semantics<parallel>, #tpu.dimension_semantics<arbitrary>], iteration_bounds = array<i64: 2, 2>, scalar_prefetch = 0 : i64, scratch_operands = 1 : i64, tpu.core_type = #tpu.core_type<tc>, window_params = [{transform_indices = @transform_0, window_bounds = array<i64: 1, 8, 32>}, {pipeline_mode = #tpu.pipeline_mode<synchronous>, transform_indices = @transform_1, window_bounds = array<i64: 8, 16>}, {pipeline_mode = #tpu.pipeline_mode<synchronous>, transform_indices = @transform_2, window_bounds = array<i64: 8, 16>}, {pipeline_mode = #tpu.pipeline_mode<synchronous>, transform_indices = @transform_3, window_bounds = array<i64: 8, 8>}, {transform_indices = @transform_4, window_bounds = array<i64: 1, 32, 32>}, {transform_indices = @transform_5, window_bounds = array<i64: 1, 32, 32>}, {transform_indices = @transform_6, window_bounds = array<i64: 1, 32, 32>}, {transform_indices = @transform_7, window_bounds = array<i64: 1, 32, 32>}, {transform_indices = @transform_8, window_bounds = array<i64: 1, 32, 64>}, {transform_indices = @transform_9, window_bounds = array<i64: 1, 1, 64>}, {transform_indices = @transform_10, window_bounds = array<i64: 1, 64, 32>}, {transform_indices = @transform_11, window_bounds = array<i64: 1, 9, 32>}, {pipeline_mode = #tpu.pipeline_mode<synchronous>, transform_indices = @transform_12, window_bounds = array<i64: 32, 128>}, {pipeline_mode = #tpu.pipeline_mode<synchronous>, transform_indices = @transform_13, window_bounds = array<i64: 1, 128>}, {transform_indices = @transform_14, window_bounds = array<i64: 1, 8, 128>}]} {
    %c0_i32 = arith.constant 0 : i32
    %0 = arith.cmpi eq, %arg1, %c0_i32 : i32
    %1 = arith.extui %0 : i1 to i32
    %c0_i32_0 = arith.constant 0 : i32
    %2 = arith.cmpi ne, %1, %c0_i32_0 : i32
    scf.if %2 {
      %c0_57 = arith.constant 0 : index
      %c0_58 = arith.constant 0 : index
      %c0_59 = arith.constant 0 : index
      %140 = vector.load %arg2[%c0_57, %c0_58, %c0_59] : memref<1x8x32xf32, #tpu.memory_space<vmem>>, vector<1x8x32xf32>
      %141 = vector.shape_cast %140 : vector<1x8x32xf32> to vector<8x32xf32>
      %c0_60 = arith.constant 0 : index
      %c0_61 = arith.constant 0 : index
      %142 = vector.load %arg17[%c0_60, %c0_61] : memref<8x32xf32, #tpu.memory_space<vmem>>, vector<8x32xf32>
      tpu.vector_store %arg17[%c0_60, %c0_61], %141 {strides = array<i32>} : memref<8x32xf32, #tpu.memory_space<vmem>>, vector<8x32xf32>,
    } else {
    }
    %c0 = arith.constant 0 : index
    %c0_1 = arith.constant 0 : index
    %3 = vector.load %arg17[%c0, %c0_1] : memref<8x32xf32, #tpu.memory_space<vmem>>, vector<8x32xf32>
    %c0_2 = arith.constant 0 : index
    %c0_3 = arith.constant 0 : index
    %4 = vector.load %arg3[%c0_2, %c0_3] : memref<8x16xf32, #tpu.memory_space<vmem>>, vector<8x16xf32>
    %c0_4 = arith.constant 0 : index
    %c0_5 = arith.constant 0 : index
    %5 = vector.load %arg4[%c0_4, %c0_5] : memref<8x16xf32, #tpu.memory_space<vmem>>, vector<8x16xf32>
    %c0_6 = arith.constant 0 : index
    %c0_7 = arith.constant 0 : index
    %6 = vector.load %arg5[%c0_6, %c0_7] : memref<8x8xf32, #tpu.memory_space<vmem>>, vector<8x8xf32>
    %cst = arith.constant 0.000000e+00 : f32
    %7 = vector.broadcast %cst : f32 to vector<8x8xf32>
    %8 = arith.cmpf oeq, %6, %7 : vector<8x8xf32>
    %c0_8 = arith.constant 0 : index
    %c0_9 = arith.constant 0 : index
    %c0_10 = arith.constant 0 : index
    %9 = vector.load %arg13[%c0_8, %c0_9, %c0_10] : memref<1x9x32xf32, #tpu.memory_space<vmem>>, vector<1x9x32xf32>
    %10 = vector.shape_cast %9 : vector<1x9x32xf32> to vector<9x32xf32>
    %11 = vector.extract_strided_slice %10 {offsets = [0, 0], sizes = [1, 32], strides = [1, 1]} : vector<9x32xf32> to vector<1x32xf32>
    %12 = vector.extract_strided_slice %10 {offsets = [1, 0], sizes = [1, 32], strides = [1, 1]} : vector<9x32xf32> to vector<1x32xf32>
    %13 = vector.extract_strided_slice %10 {offsets = [2, 0], sizes = [1, 32], strides = [1, 1]} : vector<9x32xf32> to vector<1x32xf32>
    %14 = vector.extract_strided_slice %10 {offsets = [3, 0], sizes = [1, 32], strides = [1, 1]} : vector<9x32xf32> to vector<1x32xf32>
    %15 = vector.extract_strided_slice %10 {offsets = [4, 0], sizes = [1, 32], strides = [1, 1]} : vector<9x32xf32> to vector<1x32xf32>
    %16 = vector.extract_strided_slice %10 {offsets = [5, 0], sizes = [1, 32], strides = [1, 1]} : vector<9x32xf32> to vector<1x32xf32>
    %17 = vector.extract_strided_slice %10 {offsets = [6, 0], sizes = [1, 32], strides = [1, 1]} : vector<9x32xf32> to vector<1x32xf32>
    %18 = vector.extract_strided_slice %10 {offsets = [7, 0], sizes = [1, 32], strides = [1, 1]} : vector<9x32xf32> to vector<1x32xf32>
    %19 = vector.extract_strided_slice %10 {offsets = [8, 0], sizes = [1, 32], strides = [1, 1]} : vector<9x32xf32> to vector<1x32xf32>
    %20 = arith.truncf %3 : vector<8x32xf32> to vector<8x32xbf16>
    %c0_11 = arith.constant 0 : index
    %c0_12 = arith.constant 0 : index
    %c0_13 = arith.constant 0 : index
    %21 = vector.load %arg6[%c0_11, %c0_12, %c0_13] : memref<1x32x32xbf16, #tpu.memory_space<vmem>>, vector<1x32x32xbf16>
    %22 = vector.shape_cast %21 : vector<1x32x32xbf16> to vector<32x32xbf16>
    %cst_14 = arith.constant dense<0.000000e+00> : vector<8x32xf32>
    %23 = tpu.matmul %20, %22, %cst_14 {dimension_numbers = #tpu.dot_dimension_numbers<[1], [0], [0], [1], [0, 0, 1, 1], [], []>} : vector<8x32xbf16>, vector<32x32xbf16>, vector<8x32xf32> -> vector<8x32xf32>
    %24 = vector.broadcast %11 : vector<1x32xf32> to vector<8x32xf32>
    %25 = arith.addf %23, %24 : vector<8x32xf32>
    %c0_15 = arith.constant 0 : index
    %c0_16 = arith.constant 0 : index
    %c0_17 = arith.constant 0 : index
    %26 = vector.load %arg7[%c0_15, %c0_16, %c0_17] : memref<1x32x32xbf16, #tpu.memory_space<vmem>>, vector<1x32x32xbf16>
    %27 = vector.shape_cast %26 : vector<1x32x32xbf16> to vector<32x32xbf16>
    %cst_18 = arith.constant dense<0.000000e+00> : vector<8x32xf32>
    %28 = tpu.matmul %20, %27, %cst_18 {dimension_numbers = #tpu.dot_dimension_numbers<[1], [0], [0], [1], [0, 0, 1, 1], [], []>} : vector<8x32xbf16>, vector<32x32xbf16>, vector<8x32xf32> -> vector<8x32xf32>
    %29 = vector.broadcast %12 : vector<1x32xf32> to vector<8x32xf32>
    %30 = arith.addf %28, %29 : vector<8x32xf32>
    %c0_19 = arith.constant 0 : index
    %c0_20 = arith.constant 0 : index
    %c0_21 = arith.constant 0 : index
    %31 = vector.load %arg8[%c0_19, %c0_20, %c0_21] : memref<1x32x32xbf16, #tpu.memory_space<vmem>>, vector<1x32x32xbf16>
    %32 = vector.shape_cast %31 : vector<1x32x32xbf16> to vector<32x32xbf16>
    %cst_22 = arith.constant dense<0.000000e+00> : vector<8x32xf32>
    %33 = tpu.matmul %20, %32, %cst_22 {dimension_numbers = #tpu.dot_dimension_numbers<[1], [0], [0], [1], [0, 0, 1, 1], [], []>} : vector<8x32xbf16>, vector<32x32xbf16>, vector<8x32xf32> -> vector<8x32xf32>
    %34 = vector.broadcast %13 : vector<1x32xf32> to vector<8x32xf32>
    %35 = arith.addf %33, %34 : vector<8x32xf32>
    %36 = vector.extract_strided_slice %25 {offsets = [0, 0], sizes = [8, 16], strides = [1, 1]} : vector<8x32xf32> to vector<8x16xf32>
    %37 = vector.extract_strided_slice %25 {offsets = [0, 16], sizes = [8, 16], strides = [1, 1]} : vector<8x32xf32> to vector<8x16xf32>
    %38 = arith.mulf %36, %4 : vector<8x16xf32>
    %39 = arith.mulf %37, %5 : vector<8x16xf32>
    %40 = arith.subf %38, %39 : vector<8x16xf32>
    %41 = arith.mulf %36, %5 : vector<8x16xf32>
    %42 = arith.mulf %37, %4 : vector<8x16xf32>
    %43 = arith.addf %41, %42 : vector<8x16xf32>
    %44 = tpu.concatenate %40, %43 in 1 : vector<8x16xf32>, vector<8x16xf32> -> vector<8x32xf32>
    %45 = vector.extract_strided_slice %30 {offsets = [0, 0], sizes = [8, 16], strides = [1, 1]} : vector<8x32xf32> to vector<8x16xf32>
    %46 = vector.extract_strided_slice %30 {offsets = [0, 16], sizes = [8, 16], strides = [1, 1]} : vector<8x32xf32> to vector<8x16xf32>
    %47 = arith.mulf %45, %4 : vector<8x16xf32>
    %48 = arith.mulf %46, %5 : vector<8x16xf32>
    %49 = arith.subf %47, %48 : vector<8x16xf32>
    %50 = arith.mulf %45, %5 : vector<8x16xf32>
    %51 = arith.mulf %46, %4 : vector<8x16xf32>
    %52 = arith.addf %50, %51 : vector<8x16xf32>
    %53 = tpu.concatenate %49, %52 in 1 : vector<8x16xf32>, vector<8x16xf32> -> vector<8x32xf32>
    %cst_23 = arith.constant dense<0.000000e+00> : vector<8x8xf32>
    %54 = tpu.matmul %44, %53, %cst_23 {dimension_numbers = #tpu.dot_dimension_numbers<[1], [1], [0], [0], [0, 0, 1, 0], [], []>} : vector<8x32xf32>, vector<8x32xf32>, vector<8x8xf32> -> vector<8x8xf32>
    %cst_24 = arith.constant -1.000000e+09 : f32
    %55 = vector.broadcast %cst_24 : f32 to vector<8x8xf32>
    %56 = arith.select %8, %55, %54 : vector<8x8xi1>, vector<8x8xf32>
    %cst_25 = arith.constant dense<0xFF800000> : vector<8xf32>
    %57 = vector.multi_reduction <maximumf>, %56, %cst_25 [1] : vector<8x8xf32> to vector<8xf32>
    %58 = vector.shape_cast %57 : vector<8xf32> to vector<8x1xf32>
    %59 = vector.broadcast %58 : vector<8x1xf32> to vector<8x8xf32>
    %60 = arith.subf %56, %59 : vector<8x8xf32>
    %61 = math.exp %60 : vector<8x8xf32>
    %cst_26 = arith.constant dense<0.000000e+00> : vector<8xf32>
    %62 = vector.multi_reduction <add>, %61, %cst_26 [1] : vector<8x8xf32> to vector<8xf32>
    %63 = vector.shape_cast %62 : vector<8xf32> to vector<8x1xf32>
    %64 = tpu.reciprocal %63 {approx = true} : vector<8x1xf32> -> vector<8x1xf32>
    %65 = vector.broadcast %64 : vector<8x1xf32> to vector<8x8xf32>
    %66 = arith.mulf %61, %65 : vector<8x8xf32>
    %cst_27 = arith.constant dense<0.000000e+00> : vector<8x32xf32>
    %67 = tpu.matmul %66, %35, %cst_27 {dimension_numbers = #tpu.dot_dimension_numbers<[1], [0], [0], [1], [0, 0, 1, 1], [], []>} : vector<8x8xf32>, vector<8x32xf32>, vector<8x32xf32> -> vector<8x32xf32>
    %68 = arith.truncf %67 : vector<8x32xf32> to vector<8x32xbf16>
    %c0_28 = arith.constant 0 : index
    %c0_29 = arith.constant 0 : index
    %c0_30 = arith.constant 0 : index
    %69 = vector.load %arg9[%c0_28, %c0_29, %c0_30] : memref<1x32x32xbf16, #tpu.memory_space<vmem>>, vector<1x32x32xbf16>
    %70 = vector.shape_cast %69 : vector<1x32x32xbf16> to vector<32x32xbf16>
    %cst_31 = arith.constant dense<0.000000e+00> : vector<8x32xf32>
    %71 = tpu.matmul %68, %70, %cst_31 {dimension_numbers = #tpu.dot_dimension_numbers<[1], [0], [0], [1], [0, 0, 1, 1], [], []>} : vector<8x32xbf16>, vector<32x32xbf16>, vector<8x32xf32> -> vector<8x32xf32>
    %72 = vector.broadcast %14 : vector<1x32xf32> to vector<8x32xf32>
    %73 = arith.addf %71, %72 : vector<8x32xf32>
    %74 = arith.addf %3, %73 : vector<8x32xf32>
    %cst_32 = arith.constant dense<0.000000e+00> : vector<8xf32>
    %75 = vector.multi_reduction <add>, %74, %cst_32 [1] : vector<8x32xf32> to vector<8xf32>
    %76 = vector.shape_cast %75 : vector<8xf32> to vector<8x1xf32>
    %cst_33 = arith.constant 3.200000e+01 : f32
    %77 = vector.broadcast %cst_33 : f32 to vector<8x1xf32>
    %78 = arith.divf %76, %77 : vector<8x1xf32>
    %79 = vector.broadcast %78 : vector<8x1xf32> to vector<8x32xf32>
    %80 = arith.subf %74, %79 : vector<8x32xf32>
    %81 = arith.mulf %80, %80 : vector<8x32xf32>
    %cst_34 = arith.constant dense<0.000000e+00> : vector<8xf32>
    %82 = vector.multi_reduction <add>, %81, %cst_34 [1] : vector<8x32xf32> to vector<8xf32>
    %83 = vector.shape_cast %82 : vector<8xf32> to vector<8x1xf32>
    %cst_35 = arith.constant 3.200000e+01 : f32
    %84 = vector.broadcast %cst_35 : f32 to vector<8x1xf32>
    %85 = arith.divf %83, %84 : vector<8x1xf32>
    %86 = vector.broadcast %78 : vector<8x1xf32> to vector<8x32xf32>
    %87 = arith.subf %74, %86 : vector<8x32xf32>
    %cst_36 = arith.constant 9.99999974E-6 : f32
    %88 = vector.broadcast %cst_36 : f32 to vector<8x1xf32>
    %89 = arith.addf %85, %88 : vector<8x1xf32>
    %90 = math.rsqrt %89 : vector<8x1xf32>
    %91 = vector.broadcast %90 : vector<8x1xf32> to vector<8x32xf32>
    %92 = arith.mulf %87, %91 : vector<8x32xf32>
    %93 = vector.broadcast %16 : vector<1x32xf32> to vector<8x32xf32>
    %94 = arith.mulf %92, %93 : vector<8x32xf32>
    %95 = vector.broadcast %17 : vector<1x32xf32> to vector<8x32xf32>
    %96 = arith.addf %94, %95 : vector<8x32xf32>
    %97 = arith.truncf %96 : vector<8x32xf32> to vector<8x32xbf16>
    %c0_37 = arith.constant 0 : index
    %c0_38 = arith.constant 0 : index
    %c0_39 = arith.constant 0 : index
    %98 = vector.load %arg10[%c0_37, %c0_38, %c0_39] : memref<1x32x64xbf16, #tpu.memory_space<vmem>>, vector<1x32x64xbf16>
    %99 = vector.shape_cast %98 : vector<1x32x64xbf16> to vector<32x64xbf16>
    %cst_40 = arith.constant dense<0.000000e+00> : vector<8x64xf32>
    %100 = tpu.matmul %97, %99, %cst_40 {dimension_numbers = #tpu.dot_dimension_numbers<[1], [0], [0], [1], [0, 0, 1, 1], [], []>} : vector<8x32xbf16>, vector<32x64xbf16>, vector<8x64xf32> -> vector<8x64xf32>
    %c0_41 = arith.constant 0 : index
    %c0_42 = arith.constant 0 : index
    %c0_43 = arith.constant 0 : index
    %101 = vector.load %arg11[%c0_41, %c0_42, %c0_43] : memref<1x1x64xf32, #tpu.memory_space<vmem>>, vector<1x1x64xf32>
    %102 = vector.shape_cast %101 : vector<1x1x64xf32> to vector<1x64xf32>
    %103 = vector.broadcast %102 : vector<1x64xf32> to vector<8x64xf32>
    %104 = arith.addf %100, %103 : vector<8x64xf32>
    %cst_44 = arith.constant 0.000000e+00 : f32
    %105 = vector.broadcast %cst_44 : f32 to vector<8x64xf32>
    %106 = arith.maximumf %104, %105 : vector<8x64xf32>
    %107 = arith.truncf %106 : vector<8x64xf32> to vector<8x64xbf16>
    %c0_45 = arith.constant 0 : index
    %c0_46 = arith.constant 0 : index
    %c0_47 = arith.constant 0 : index
    %108 = vector.load %arg12[%c0_45, %c0_46, %c0_47] : memref<1x64x32xbf16, #tpu.memory_space<vmem>>, vector<1x64x32xbf16>
    %109 = vector.shape_cast %108 : vector<1x64x32xbf16> to vector<64x32xbf16>
    %cst_48 = arith.constant dense<0.000000e+00> : vector<8x32xf32>
    %110 = tpu.matmul %107, %109, %cst_48 {dimension_numbers = #tpu.dot_dimension_numbers<[1], [0], [0], [1], [0, 0, 1, 1], [], []>} : vector<8x64xbf16>, vector<64x32xbf16>, vector<8x32xf32> -> vector<8x32xf32>
    %111 = vector.broadcast %15 : vector<1x32xf32> to vector<8x32xf32>
    %112 = arith.addf %110, %111 : vector<8x32xf32>
    %113 = arith.addf %96, %112 : vector<8x32xf32>
    %cst_49 = arith.constant dense<0.000000e+00> : vector<8xf32>
    %114 = vector.multi_reduction <add>, %113, %cst_49 [1] : vector<8x32xf32> to vector<8xf32>
    %115 = vector.shape_cast %114 : vector<8xf32> to vector<8x1xf32>
    %cst_50 = arith.constant 3.200000e+01 : f32
    %116 = vector.broadcast %cst_50 : f32 to vector<8x1xf32>
    %117 = arith.divf %115, %116 : vector<8x1xf32>
    %118 = vector.broadcast %117 : vector<8x1xf32> to vector<8x32xf32>
    %119 = arith.subf %113, %118 : vector<8x32xf32>
    %120 = arith.mulf %119, %119 : vector<8x32xf32>
    %cst_51 = arith.constant dense<0.000000e+00> : vector<8xf32>
    %121 = vector.multi_reduction <add>, %120, %cst_51 [1] : vector<8x32xf32> to vector<8xf32>
    %122 = vector.shape_cast %121 : vector<8xf32> to vector<8x1xf32>
    %cst_52 = arith.constant 3.200000e+01 : f32
    %123 = vector.broadcast %cst_52 : f32 to vector<8x1xf32>
    %124 = arith.divf %122, %123 : vector<8x1xf32>
    %125 = vector.broadcast %117 : vector<8x1xf32> to vector<8x32xf32>
    %126 = arith.subf %113, %125 : vector<8x32xf32>
    %cst_53 = arith.constant 9.99999974E-6 : f32
    %127 = vector.broadcast %cst_53 : f32 to vector<8x1xf32>
    %128 = arith.addf %124, %127 : vector<8x1xf32>
    %129 = math.rsqrt %128 : vector<8x1xf32>
    %130 = vector.broadcast %129 : vector<8x1xf32> to vector<8x32xf32>
    %131 = arith.mulf %126, %130 : vector<8x32xf32>
    %132 = vector.broadcast %18 : vector<1x32xf32> to vector<8x32xf32>
    %133 = arith.mulf %131, %132 : vector<8x32xf32>
    %134 = vector.broadcast %19 : vector<1x32xf32> to vector<8x32xf32>
    %135 = arith.addf %133, %134 : vector<8x32xf32>
    %c0_54 = arith.constant 0 : index
    %c0_55 = arith.constant 0 : index
    %136 = vector.load %arg17[%c0_54, %c0_55] : memref<8x32xf32, #tpu.memory_space<vmem>>, vector<8x32xf32>
    tpu.vector_store %arg17[%c0_54, %c0_55], %135 {strides = array<i32>} : memref<8x32xf32, #tpu.memory_space<vmem>>, vector<8x32xf32>,
    %c1_i32 = arith.constant 1 : i32
    %137 = arith.cmpi eq, %arg1, %c1_i32 : i32
    %138 = arith.extui %137 : i1 to i32
    %c0_i32_56 = arith.constant 0 : i32
    %139 = arith.cmpi ne, %138, %c0_i32_56 : i32
    scf.if %139 {
      %140 = arith.truncf %135 : vector<8x32xf32> to vector<8x32xbf16>
      %c0_57 = arith.constant 0 : index
      %c0_58 = arith.constant 0 : index
      %141 = vector.load %arg14[%c0_57, %c0_58] : memref<32x128xbf16, #tpu.memory_space<vmem>>, vector<32x128xbf16>
      %cst_59 = arith.constant dense<0.000000e+00> : vector<8x128xf32>
      %142 = tpu.matmul %140, %141, %cst_59 {dimension_numbers = #tpu.dot_dimension_numbers<[1], [0], [0], [1], [0, 0, 1, 1], [], []>} : vector<8x32xbf16>, vector<32x128xbf16>, vector<8x128xf32> -> vector<8x128xf32>
      %c0_60 = arith.constant 0 : index
      %c0_61 = arith.constant 0 : index
      %143 = vector.load %arg15[%c0_60, %c0_61] : memref<1x128xf32, #tpu.memory_space<vmem>>, vector<1x128xf32>
      %144 = vector.broadcast %143 : vector<1x128xf32> to vector<8x128xf32>
      %145 = arith.addf %142, %144 : vector<8x128xf32>
      %c0_62 = arith.constant 0 : index
      %c0_63 = arith.constant 0 : index
      %c0_64 = arith.constant 0 : index
      %146 = vector.load %arg16[%c0_62, %c0_63, %c0_64] : memref<1x8x128xf32, #tpu.memory_space<vmem>>, vector<1x8x128xf32>
      %147 = vector.shape_cast %146 : vector<1x8x128xf32> to vector<8x128xf32>
      %148 = vector.shape_cast %145 : vector<8x128xf32> to vector<1x8x128xf32>
      tpu.vector_store %arg16[%c0_62, %c0_63, %c0_64], %148 {strides = array<i32>} : memref<1x8x128xf32, #tpu.memory_space<vmem>>, vector<1x8x128xf32>,
    } else {
    }
    return
  }
  func.func @transform_0(%arg0: i32, %arg1: i32) -> (i32, i32, i32) {
    %c0_i32 = arith.constant 0 : i32
    %c0_i32_0 = arith.constant 0 : i32
    %c0_i32_1 = arith.constant 0 : i32
    return %arg0, %c0_i32, %c0_i32_0 : i32, i32, i32
  }
  func.func @transform_1(%arg0: i32, %arg1: i32) -> (i32, i32) {
    %c0_i32 = arith.constant 0 : i32
    %c0_i32_0 = arith.constant 0 : i32
    %c0_i32_1 = arith.constant 0 : i32
    return %c0_i32, %c0_i32_0 : i32, i32
  }
  func.func @transform_2(%arg0: i32, %arg1: i32) -> (i32, i32) {
    %c0_i32 = arith.constant 0 : i32
    %c0_i32_0 = arith.constant 0 : i32
    %c0_i32_1 = arith.constant 0 : i32
    return %c0_i32, %c0_i32_0 : i32, i32
  }
  func.func @transform_3(%arg0: i32, %arg1: i32) -> (i32, i32) {
    %c0_i32 = arith.constant 0 : i32
    %c0_i32_0 = arith.constant 0 : i32
    %c0_i32_1 = arith.constant 0 : i32
    return %c0_i32, %c0_i32_0 : i32, i32
  }
  func.func @transform_4(%arg0: i32, %arg1: i32) -> (i32, i32, i32) {
    %c0_i32 = arith.constant 0 : i32
    %c0_i32_0 = arith.constant 0 : i32
    %c0_i32_1 = arith.constant 0 : i32
    return %arg1, %c0_i32, %c0_i32_0 : i32, i32, i32
  }
  func.func @transform_5(%arg0: i32, %arg1: i32) -> (i32, i32, i32) {
    %c0_i32 = arith.constant 0 : i32
    %c0_i32_0 = arith.constant 0 : i32
    %c0_i32_1 = arith.constant 0 : i32
    return %arg1, %c0_i32, %c0_i32_0 : i32, i32, i32
  }
  func.func @transform_6(%arg0: i32, %arg1: i32) -> (i32, i32, i32) {
    %c0_i32 = arith.constant 0 : i32
    %c0_i32_0 = arith.constant 0 : i32
    %c0_i32_1 = arith.constant 0 : i32
    return %arg1, %c0_i32, %c0_i32_0 : i32, i32, i32
  }
  func.func @transform_7(%arg0: i32, %arg1: i32) -> (i32, i32, i32) {
    %c0_i32 = arith.constant 0 : i32
    %c0_i32_0 = arith.constant 0 : i32
    %c0_i32_1 = arith.constant 0 : i32
    return %arg1, %c0_i32, %c0_i32_0 : i32, i32, i32
  }
  func.func @transform_8(%arg0: i32, %arg1: i32) -> (i32, i32, i32) {
    %c0_i32 = arith.constant 0 : i32
    %c0_i32_0 = arith.constant 0 : i32
    %c0_i32_1 = arith.constant 0 : i32
    return %arg1, %c0_i32, %c0_i32_0 : i32, i32, i32
  }
  func.func @transform_9(%arg0: i32, %arg1: i32) -> (i32, i32, i32) {
    %c0_i32 = arith.constant 0 : i32
    %c0_i32_0 = arith.constant 0 : i32
    %c0_i32_1 = arith.constant 0 : i32
    return %arg1, %c0_i32, %c0_i32_0 : i32, i32, i32
  }
  func.func @transform_10(%arg0: i32, %arg1: i32) -> (i32, i32, i32) {
    %c0_i32 = arith.constant 0 : i32
    %c0_i32_0 = arith.constant 0 : i32
    %c0_i32_1 = arith.constant 0 : i32
    return %arg1, %c0_i32, %c0_i32_0 : i32, i32, i32
  }
  func.func @transform_11(%arg0: i32, %arg1: i32) -> (i32, i32, i32) {
    %c0_i32 = arith.constant 0 : i32
    %c0_i32_0 = arith.constant 0 : i32
    %c0_i32_1 = arith.constant 0 : i32
    return %arg1, %c0_i32, %c0_i32_0 : i32, i32, i32
  }
  func.func @transform_12(%arg0: i32, %arg1: i32) -> (i32, i32) {
    %c0_i32 = arith.constant 0 : i32
    %c0_i32_0 = arith.constant 0 : i32
    %c0_i32_1 = arith.constant 0 : i32
    return %c0_i32, %c0_i32_0 : i32, i32
  }
  func.func @transform_13(%arg0: i32, %arg1: i32) -> (i32, i32) {
    %c0_i32 = arith.constant 0 : i32
    %c0_i32_0 = arith.constant 0 : i32
    %c0_i32_1 = arith.constant 0 : i32
    return %c0_i32, %c0_i32_0 : i32, i32
  }
  func.func @transform_14(%arg0: i32, %arg1: i32) -> (i32, i32, i32) {
    %c0_i32 = arith.constant 0 : i32
    %c0_i32_0 = arith.constant 0 : i32
    %c0_i32_1 = arith.constant 0 : i32
    return %arg0, %c0_i32, %c0_i32_0 : i32, i32, i32
  }
}

</mosaic_0001>

<bundles_post_ra>
// kernel: tpu_custom_call.1
= control target key start
LH: loop header
LB: loop body
LE: loop exit
PB: predicated region body
PF: predicated region fallthrough
CT: control target
= control target key end

     0   :  { %s3020_s0 = inlined_call_operand.hbm [shape: f32[2,8,32], index: 0, kind: input, shape index: {}]   ;;  %s3021_s1 = inlined_call_operand.hbm [shape: f32[8,16], index: 1, kind: input, shape index: {}]   ;;  %s3022_s2 = inlined_call_operand.hbm [shape: f32[8,16], index: 2, kind: input, shape index: {}]   ;;  %s3023_s3 = inlined_call_operand.hbm [shape: f32[8,8], index: 3, kind: input, shape index: {}]   ;;  %s3024_s4 = inlined_call_operand.vmem [shape: bf16[2,32,32], index: 4, kind: input, shape index: {}]   ;;  %s3025_s5 = inlined_call_operand.vmem [shape: bf16[2,32,32], index: 5, kind: input, shape index: {}]   ;;  %s3026_s6 = inlined_call_operand.vmem [shape: bf16[2,32,32], index: 6, kind: input, shape index: {}]   ;;  %s3027_s7 = inlined_call_operand.vmem [shape: bf16[2,32,32], index: 7, kind: input, shape index: {}]   ;;  %s3028_s8 = inlined_call_operand.hbm [shape: bf16[2,32,64], index: 8, kind: input, shape index: {}]   ;;  %s3029_s9 = inlined_call_operand.vmem [shape: f32[2,1,64], index: 9, kind: input, shape index: {}]   ;;  %s3030_s10 = inlined_call_operand.vmem [shape: bf16[2,64,32], index: 10, kind: input, shape index: {}]   ;;  %s3031_s11 = inlined_call_operand.vmem [shape: f32[2,9,32], index: 11, kind: input, shape index: {}]   ;;  %s3032_s12 = inlined_call_operand.hbm [shape: bf16[32,128], index: 12, kind: input, shape index: {}]   ;;  %s3033_s13 = inlined_call_operand.vmem [shape: f32[1,128], index: 13, kind: input, shape index: {}]   ;;  %s3034_s14 = inlined_call_operand.hbm [shape: f32[2,8,128], index: 14, kind: output, shape index: {}]  }
   0x1   :  { %3055 = sst [smem:[#allocation30_spill]] %s3020_s0 }
   0x2   :  { %3056 = sst [smem:[#allocation31_spill]] %s3021_s1 }
   0x3   :  { %3057 = sst [smem:[#allocation32_spill]] %s3022_s2 }
   0x4   :  { %3058 = sst [smem:[#allocation33_spill]] %s3023_s3 }
   0x5   :  { %3059 = sst [smem:[#allocation34_spill]] %s3024_s4 }
   0x6   :  { %3060 = sst [smem:[#allocation35_spill]] %s3025_s5 }
   0x7   :  { %3061 = sst [smem:[#allocation36_spill]] %s3026_s6 }
   0x8   :  { %3062 = sst [smem:[#allocation37_spill]] %s3027_s7 }
   0x9   :  { %3063 = sst [smem:[#allocation38_spill]] %s3028_s8 }
   0xa   :  { %3064 = sst [smem:[#allocation39_spill]] %s3029_s9 }
   0xb   :  { %3065 = sst [smem:[#allocation40_spill]] %s3030_s10 }
   0xc   :  { %3066 = sst [smem:[#allocation41_spill]] %s3031_s11 }
   0xd   :  { %3067 = sst [smem:[#allocation42_spill]] %s3032_s12 }
   0xe   :  { %3068 = sst [smem:[#allocation43_spill]] %s3033_s13 }
   0xf   :  { %3069 = sst [smem:[#allocation44_spill]] %s3034_s14 }
  0x10   :  { %19 = vsyncpa [#allocation4], 0 }
  0x11   :  { %21 = vsyncpa [#allocation4 + $0x1], 0 }
  0x12   :  { %22 = vsyncpa [#allocation7], 0 }
  0x13   :  { %23 = vsyncpa [#allocation10], 0 }
  0x14   :  { %24 = vsyncpa [#allocation5], 0 }
  0x15   :  { %26 = vsyncpa [#allocation5 + $0x1], 0  ;;  %s2450_s29 = smov 0   ;;  %s2452_s30 = smov 0  }
  0x16   :  { %s2454_s15 = smov 0   ;;  %s2456_s16 = smov 0  }
  0x17   :  { %s2458_s17 = smov 0   ;;  %s2460_s18 = smov 0  }
  0x18   :  { %s2462_s19 = smov 0   ;;  %s2464_s20 = smov 0  }
  0x19   :  { %s2466_s21 = smov 0   ;;  %s2468_s22 = smov 0  }
  0x1a   :  { %s2470_s23 = smov 0  }
  0x1b LB: > { %3070 = sst [smem:[#allocation20_spill]] %s2330_s16  ;;  %s2506_s24 = sadd.s32 4294967295, %s2358_s23   ;;  %s2358_s23 = sphi %s2470_s23, %s32_s23   ;;  %s2354_s22 = sphi %s2468_s22, %s3138_s22   ;;  %s2350_s21 = sphi %s2466_s21, %s3137_s21   ;;  %s2346_s20 = sphi %s2464_s20, %s3136_s20   ;;  %s2342_s19 = sphi %s2462_s19, %s3135_s19   ;;  %s2338_s18 = sphi %s2460_s18, %s3134_s18   ;;  %s2334_s17 = sphi %s2458_s17, %s3143_s17   ;;  %s2330_s16 = sphi %s2456_s16, %s3142_s16   ;;  %s2326_s15 = sphi %s2454_s15, %s3141_s15   ;;  %s2322_s30 = sphi %s2452_s30, %s3140_s30   ;;  %s2318_s29 = sphi %s2450_s29, %s3139_s29  }
  0x1c   : > { %3071 = sst [smem:[#allocation21_spill]] %s2338_s18  ;;  %p1698_p0 = scmp.ge.s32.totalorder %s2358_s23, 1 }
  0x1d   : > { %3072 = sst [smem:[#allocation22_spill]] %s2346_s20  ;;  %p3036_p1 = scmp.eq.s32.totalorder %s2506_s24, 0 }
  0x1e   : > { %3073 = sst [smem:[#allocation23_spill]] %s2350_s21  ;;  %p414_p2 = scmp.lt.s32.totalorder %s2358_s23, 5 }
  0x1f   : > { %3074 = sst [smem:[#allocation24_spill]] %s2354_s22  ;;  %s2360_s26 = smov [#allocation6]  }
  0x20   : > { %3075 = sst [smem:[#allocation25_spill]] %s2358_s23  ;;  %p2511_p3 = pnand %p1698_p0, %p414_p2 }
  0x21   : > { %s427_s27 = sshll.u32 %s2360_s26, 4  ;;  %s2361_s28 = smov [#allocation8]   ;;  %s428_s27 = int_to_ptr.vmem [resolvable:$true] %s427_s27 }
  0x22   : > { %s3076_s25 = scalar_select %p2511_p3, 1, 0 }
  0x23   : > { %p1890_p4 = pneg %p2511_p3  ;;  %s438_s14 = sshll.u32 %s2361_s28, 4  ;;  %s2523_s14 = int_to_ptr.vmem [resolvable:$true] %s438_s14 }
  0x24   : > { %s3078_s1 = sld [smem:[#allocation31_spill]] }
  0x25   : > { %p2519_p5 = pnand %p1890_p4, %p3036_p1 }
  0x27   : > { %s3077_s20 = scalar_select %p2519_p5, 1, 0 }
  0x28   : > { %p2533_p7 = pneg %p2519_p5 }
  0x2a   : > { %s2048_s11 = scalar_lea.hbm %s3078_s1, 128 }
  0x2b   : > { %p2049_p6 = scmp.ne.s32.totalorder %s3078_s1, %s2048_s11  ;;  %p2055_p10 = scmp.lt.u32.totalorder %s2048_s11, %s3078_s1 }
  0x2d   : > { %p2051_p8 = pnand %p2533_p7, %p2049_p6 }
  0x2f   : > { %p2052_p9 = pneg %p2051_p8 }
  0x31   : > { %p2057_p11 = pnand %p2055_p10, %p2052_p9 }
  0x33   : > { %2060 = shalt.err (!%p2057_p11)
}
  0x34   : > { %s2061_s10 = scalar_lea.vmem %s428_s27, 128  ;;  %p2069_p2 = scmp.lt.s32.totalorder %s428_s27, %s428_s27 }
  0x35   : > { %p2062_p12 = scmp.ne.s32.totalorder %s428_s27, %s2061_s10  ;;  %p2070_p4 = scmp.lt.s32.totalorder %s2061_s10, %s2061_s10 }
  0x37   : > { %p2064_p13 = pnand %p2062_p12, %p2533_p7  ;;  %p2071_p1 = por %p2070_p4, %p2069_p2 }
  0x39   : > { %p2065_p0 = pneg %p2064_p13 }
  0x3b   : > { %p2072_p3 = pnand %p2071_p1, %p2065_p0 }
  0x3d   : > { %2075 = shalt.err (!%p2072_p3)
}
  0x3e   : > { %1893 = dma.hbm_to_vmem [thread:$0]  (!%p2519_p5), %s3078_s1, 128, %s428_s27, [#allocation7]  }
  0x3f   : > { %s3080_s2 = sld [smem:[#allocation32_spill]] }
  0x45   : > { %s2076_s13 = scalar_lea.hbm %s3080_s2, 128 }
  0x46   : > { %p2077_p6 = scmp.ne.s32.totalorder %s3080_s2, %s2076_s13  ;;  %p2083_p1 = scmp.lt.u32.totalorder %s2076_s13, %s3080_s2 }
  0x48   : > { %p2079_p8 = pnand %p2077_p6, %p2533_p7 }
  0x4a   : > { %p2080_p9 = pneg %p2079_p8 }
  0x4c   : > { %p2085_p3 = pnand %p2083_p1, %p2080_p9 }
  0x4e   : > { %2088 = shalt.err (!%p2085_p3)
}
  0x4f   : > { %s2089_s27 = scalar_lea.vmem %s2523_s14, 128  ;;  %p2097_p13 = scmp.lt.s32.totalorder %s2523_s14, %s2523_s14 }
  0x50   : > { %p2090_p10 = scmp.ne.s32.totalorder %s2523_s14, %s2089_s27  ;;  %p2098_p0 = scmp.lt.s32.totalorder %s2089_s27, %s2089_s27 }
  0x52   : > { %p2092_p11 = pnand %p2090_p10, %p2533_p7  ;;  %p2099_p2 = por %p2098_p0, %p2097_p13 }
  0x54   : > { %p2093_p12 = pneg %p2092_p11 }
  0x56   : > { %p2100_p4 = pnand %p2099_p2, %p2093_p12 }
  0x58   : > { %2103 = shalt.err (!%p2100_p4)
}
  0x59   : > { %1896 = dma.hbm_to_vmem [thread:$0]  (!%p2519_p5), %s3080_s2, 128, %s2523_s14, [#allocation7]  }
  0x5a   : > { %s1697_s6 = sadd.s32 4294967294, %s2358_s23   ;;  %s41_s7 = sadd.s32 1, %s2350_s21 }
  0x5b   : > { %p42_p6 = scmp.ge.s32.totalorder %s41_s7, 2  ;;  %s44_s5 = sadd.s32 1, %s2354_s22 }
  0x5c   : > { %s51_s11 = sadd.s32 1, %s2338_s18  ;;  %p3039_p8 = scmp.ne.s32.totalorder %s2338_s18, %s2334_s17 }
  0x5d   : > { %s3145_s7 = smov (%p42_p6, %s41_s7), 0  ;;  %s3147_s5 = smov (!%p42_p6, %s44_s5), %s2354_s22 }
  0x5e   : > { %3081 = sst [smem:[#allocation26_spill]] %s3145_s7  ;;  %p59_p9 = scmp.eq.s32.totalorder %s2358_s23, 0 }
  0x5f   : > { %p3038_p1 = scmp.ne.s32.totalorder %s2334_s17, %s2330_s16  ;;  %p46_p3 = scmp.ge.s32.totalorder %s3147_s5, 2 }
  0x60   : > { %s241_s14 = ssub.s32 %s2350_s21, %s3145_s7  ;;  %p2591_p10 = por %p59_p9, %p3039_p8 }
  0x61   : > { %p3083_p11 = scmp.eq.s32.totalorder %s2506_s24, 0  ;;  %s3149_s5 = smov (%p46_p3, %s3147_s5), 0 }
  0x62   : > { %3085 = sst [smem:[#allocation27_spill]] %s3149_s5  ;;  %p242_p13 = scmp.eq.s32.totalorder %s241_s14, 0 }
  0x63   : > { %p2600_p12 = por %p3083_p11, %p3038_p1  ;;  %s244_s10 = sadd.s32 1, %s2326_s15 }
  0x64   : > { %s48_s27 = ssub.s32 %s2354_s22, %s3149_s5  ;;  %p251_p0 = scmp.ne.s32.totalorder %s2326_s15, %s2322_s30 }
  0x65   : > { %s3084_s28 = scalar_select %p2600_p12, 1, 0 }
  0x66   : > { %p49_p2 = scmp.eq.s32.totalorder %s48_s27, 0  ;;  %p257_p4 = scmp.ne.s32.totalorder %s2322_s30, %s2318_s29 }
  0x67   : > { %s2614_s4 = scalar_select %p242_p13, %s2326_s15, %s244_s10  }
  0x68   : > { %s2617_s9 = scalar_select %p49_p2, %s2338_s18, %s51_s11  }
  0x69   : > { %3086 = sst [smem:[#allocation28_spill]] %s2614_s4  ;;  %p2621_p6 = por %p251_p0, %p59_p9 }
  0x6a   : > { %3087 = sst [smem:[#allocation29_spill]] %s2617_s9  ;;  %p3089_p3 = pmov %p3083_p11 }
  0x6b   : > { %p401_p1 = scmp.eq.s32.totalorder %s2506_s24, 3  ;;  %p407_p8 = scmp.eq.s32.totalorder %s1697_s6, 3 }
  0x6c   : > { %p2627_p11 = por %p257_p4, %p3089_p3  ;;  %p1918_p12 = scmp.lt.s32.totalorder %s2358_s23, 4 }
  0x6d   : > { %s476_s29 = sand.u32 1, %s2358_s23   ;;  %p3091_p13 = scmp.ne.s32.totalorder %s2338_s18, %s2334_s17 }
  0x6e   : > { %s3090_s14 = scalar_select %p2627_p11, 1, 0 }
  0x6f   : > { %p2637_p5 = por %p401_p1, %p3091_p13  ;;  %p3093_p2 = scmp.ne.s32.totalorder %s2334_s17, %s2330_s16 }
  0x70   : > { %s478_s27 = sand.u32 1, %s2338_s18   ;;  %s1705_s5 = sshll.u32 %s2354_s22, 7 }
  0x71   : > { %s3092_s10 = scalar_select %p2637_p5, 1, 0 }
  0x72   : > { %p2644_p9 = por %p407_p8, %p3093_p2  ;;  %s1704_s2 = sshll.u32 %s478_s27, 3 }
  0x73   : > { %s3095_s0 = sld [smem:[#allocation30_spill]]  ;;  %s480_s6 = scalar_lea.vmem [#allocation3], %s1704_s2 }
  0x74   : > { %s3094_s11 = scalar_select %p2644_p9, 1, 0 }
  0x75   : > { %s487_s23 = sshll.u32 %s480_s6, 4  ;;  %p2657_p1 = pnand %p1918_p12, %p2591_p10  ;;  %s2661_s23 = int_to_ptr.vmem [resolvable:$true] %s487_s23 }
  0x76   : > { %p2665_p8 = pnand %p1918_p12, %p2621_p6 }
  0x77   : > { %p2106_p4 = pneg %p2657_p1 }
  0x78   : > { %s3097_s7 = scalar_select %p2665_p8, 1, 0 }
  0x79   : > { %s2653_s4 = scalar_lea.hbm %s3095_s0, %s1705_s5  ;;  %s2669_s5 = scalar_lea.sflag [#allocation4], %s476_s29 }
  0x7a   : > { %s2104_s9 = scalar_lea.hbm %s2653_s4, 128  ;;  %s2109_s27 = scalar_lea.hbm %s3095_s0, 256 }
  0x7b   : > { %p2105_p0 = scmp.ne.s32.totalorder %s2653_s4, %s2104_s9  ;;  %p2110_p12 = scmp.lt.u32.totalorder %s2653_s4, %s3095_s0 }
  0x7c   : > { %p2111_p6 = scmp.lt.u32.totalorder %s2109_s27, %s2104_s9  ;;  %p2113_p2 = scmp.lt.u32.totalorder %s2104_s9, %s2653_s4 }
  0x7d   : > { %p2107_p10 = pnand %p2106_p4, %p2105_p0 }
  0x7e   : > { %p2112_p13 = por %p2111_p6, %p2110_p12 }
  0x7f   : > { %p2108_p3 = pneg %p2107_p10 }
  0x80   : > { %p2114_p9 = por %p2113_p2, %p2112_p13 }
  0x82   : > { %p2115_p5 = pnand %p2114_p9, %p2108_p3 }
  0x84   : > { %2118 = shalt.err (!%p2115_p5)
}
  0x85   : > { %s2119_s29 = scalar_lea.vmem %s2661_s23, 128  ;;  %s2362_s2 = smov [#allocation3]  }
  0x86   : > { %p2120_p0 = scmp.ne.s32.totalorder %s2661_s23, %s2119_s29  ;;  %s2124_s13 = sshll.u32 %s2362_s2, 4  ;;  %s2125_s13 = int_to_ptr.vmem [resolvable:$false] %s2124_s13 }
  0x87   : > { %s2126_s6 = scalar_lea.vmem %s2125_s13, 256  ;;  %p2127_p8 = scmp.lt.s32.totalorder %s2661_s23, %s2125_s13 }
  0x88   : > { %p2122_p10 = pnand %p2120_p0, %p2106_p4  ;;  %p2128_p12 = scmp.lt.s32.totalorder %s2126_s6, %s2119_s29 }
  0x8a   : > { %p2123_p11 = pneg %p2122_p10  ;;  %p2129_p6 = por %p2128_p12, %p2127_p8 }
  0x8c   : > { %p2130_p13 = pnand %p2129_p6, %p2123_p11 }
  0x8e   : > { %2133 = shalt.err (!%p2130_p13)
}
  0x8f   : > { %1906 = dma.hbm_to_vmem [thread:$0]  (!%p2657_p1), %s2653_s4, 128, %s2661_s23, %s2669_s5  }
  0x90   : > { %s2363_s9 = smov [#allocation9]   ;;  %s3098_s3 = sld [smem:[#allocation33_spill]] }
  0x91   : > { %s449_s27 = sshll.u32 %s2363_s9, 4  ;;  %s450_s27 = int_to_ptr.vmem [resolvable:$true] %s449_s27 }
  0x96   : > { %s2134_s2 = scalar_lea.hbm %s3098_s3, 128 }
  0x97   : > { %p2135_p5 = scmp.ne.s32.totalorder %s3098_s3, %s2134_s2  ;;  %p2141_p8 = scmp.lt.u32.totalorder %s2134_s2, %s3098_s3 }
  0x99   : > { %p2137_p11 = pnand %p2135_p5, %p2533_p7 }
  0x9b   : > { %p2138_p9 = pneg %p2137_p11 }
  0x9d   : > { %p2143_p4 = pnand %p2141_p8, %p2138_p9 }
  0x9f   : > { %2146 = shalt.err (!%p2143_p4)
}
  0xa0   : > { %s2147_s23 = scalar_lea.vmem %s450_s27, 128  ;;  %p2155_p0 = scmp.lt.s32.totalorder %s450_s27, %s450_s27 }
  0xa1   : > { %p2148_p1 = scmp.ne.s32.totalorder %s450_s27, %s2147_s23  ;;  %p2156_p10 = scmp.lt.s32.totalorder %s2147_s23, %s2147_s23 }
  0xa3   : > { %p2150_p3 = pnand %p2148_p1, %p2533_p7  ;;  %p2157_p12 = por %p2156_p10, %p2155_p0 }
  0xa5   : > { %p2151_p2 = pneg %p2150_p3 }
  0xa7   : > { %p2158_p6 = pnand %p2157_p12, %p2151_p2 }
  0xa9   : > { %2161 = shalt.err (!%p2158_p6)
}
  0xaa   : > { %p3099_p13 = scmp.ne.s32.totalorder %s3077_s20, 0  ;;  %s2364_s4 = smov [#allocation12]  }
  0xab   : > { %s459_s6 = sshll.u32 %s2364_s4, 4  ;;  %s3100_s12 = sld [smem:[#allocation42_spill]]  ;;  %s460_s6 = int_to_ptr.vmem [resolvable:$true] %s459_s6 }
  0xac   : > { %1899 = dma.hbm_to_vmem [thread:$0]  (!%p3099_p13), %s3098_s3, 128, %s450_s27, [#allocation10]  }
  0xb1   : > { %s2162_s2 = scalar_lea.hbm %s3100_s12, 256 }
  0xb2   : > { %p2163_p5 = scmp.ne.s32.totalorder %s3100_s12, %s2162_s2  ;;  %p2169_p8 = scmp.lt.u32.totalorder %s2162_s2, %s3100_s12 }
  0xb4   : > { %p2165_p11 = pnand %p2163_p5, %p2533_p7 }
  0xb6   : > { %p2166_p9 = pneg %p2165_p11 }
  0xb8   : > { %p2171_p4 = pnand %p2169_p8, %p2166_p9 }
  0xba   : > { %2174 = shalt.err (!%p2171_p4)
}
  0xbb   : > { %s2175_s27 = scalar_lea.vmem %s460_s6, 256  ;;  %p2183_p0 = scmp.lt.s32.totalorder %s460_s6, %s460_s6 }
  0xbc   : > { %p2176_p1 = scmp.ne.s32.totalorder %s460_s6, %s2175_s27  ;;  %p2184_p10 = scmp.lt.s32.totalorder %s2175_s27, %s2175_s27 }
  0xbe   : > { %p2178_p3 = pnand %p2176_p1, %p2533_p7  ;;  %p2185_p12 = por %p2184_p10, %p2183_p0 }
  0xc0   : > { %p2179_p2 = pneg %p2178_p3 }
  0xc2   : > { %p2186_p6 = pnand %p2185_p12, %p2179_p2 }
  0xc4   : > { %2189 = shalt.err (!%p2186_p6)
}
  0xc5   : > { %s2365_s0 = smov 64   ;;  %s2366_s22 = smov 4  }
  0xc6   : > { %1902 = dma.hbm_to_vmem [thread:$0]  (!%p3099_p13), %s3100_s12, 256, %s460_s6, [#allocation7], %s2365_s0, %s2365_s0, %s2366_s22  }
  0xc7   : > { %s528_s9 = sand.u32 1, %s2326_s15   ;;  %s1764_s1 = sshll.u32 %s2350_s21, 8 }
  0xc8   : > { %s1706_s2 = sshll.u32 %s528_s9, 4  ;;  %s3101_s8 = sld [smem:[#allocation38_spill]] }
  0xc9   : > { %s530_s20 = scalar_lea.vmem [#allocation11], %s1706_s2  ;;  %p3102_p5 = scmp.ne.s32.totalorder %s3097_s7, 0 }
  0xca   : > { %s537_s23 = sshll.u32 %s530_s20, 4  ;;  %s2743_s23 = int_to_ptr.vmem [resolvable:$true] %s537_s23 }
  0xcb   : > { %p2192_p13 = pneg %p3102_p5 }
  0xce   : > { %s2741_s29 = scalar_lea.hbm %s3101_s8, %s1764_s1  ;;  %s2195_s26 = scalar_lea.hbm %s3101_s8, 512 }
  0xcf   : > { %s2190_s27 = scalar_lea.hbm %s2741_s29, 256  ;;  %p2196_p8 = scmp.lt.u32.totalorder %s2741_s29, %s3101_s8 }
  0xd0   : > { %p2191_p7 = scmp.ne.s32.totalorder %s2741_s29, %s2190_s27  ;;  %p2197_p4 = scmp.lt.u32.totalorder %s2195_s26, %s2190_s27 }
  0xd1   : > { %p2199_p3 = scmp.lt.u32.totalorder %s2190_s27, %s2741_s29 }
  0xd2   : > { %p2193_p11 = pnand %p2192_p13, %p2191_p7  ;;  %p2198_p1 = por %p2197_p4, %p2196_p8 }
  0xd4   : > { %p2194_p9 = pneg %p2193_p11  ;;  %p2200_p2 = por %p2199_p3, %p2198_p1 }
  0xd6   : > { %p2201_p0 = pnand %p2200_p2, %p2194_p9 }
  0xd8   : > { %2204 = shalt.err (!%p2201_p0)
}
  0xd9   : > { %s2205_s2 = scalar_lea.vmem %s2743_s23, 256  ;;  %s2367_s13 = smov [#allocation11]  }
  0xda   : > { %p2206_p10 = scmp.ne.s32.totalorder %s2743_s23, %s2205_s2  ;;  %s2210_s16 = sshll.u32 %s2367_s13, 4  ;;  %s2211_s16 = int_to_ptr.vmem [resolvable:$false] %s2210_s16 }
  0xdb   : > { %s2212_s20 = scalar_lea.vmem %s2211_s16, 512  ;;  %p2213_p7 = scmp.lt.s32.totalorder %s2743_s23, %s2211_s16 }
  0xdc   : > { %p2208_p12 = pnand %p2206_p10, %p2192_p13  ;;  %p2214_p11 = scmp.lt.s32.totalorder %s2212_s20, %s2205_s2 }
  0xde   : > { %p2209_p6 = pneg %p2208_p12  ;;  %p2215_p8 = por %p2214_p11, %p2213_p7 }
  0xe0   : > { %p2216_p4 = pnand %p2215_p8, %p2209_p6 }
  0xe2   : > { %2219 = shalt.err (!%p2216_p4)
}
  0xe3   : > { %1909 = dma.hbm_to_vmem [thread:$0]  (!%p3102_p5), %s2741_s29, 256, %s2743_s23, %s2669_s5, %s2365_s0, %s2365_s0, %s2366_s22  }
  0xe4   : > { %p3103_p13 = scmp.ne.s32.totalorder %s3076_s25, 0 }
  0xe5   : > { %s573_s27 = sand.u32 (!%p3103_p13), 1, %s2506_s24   ;;  %s3052_s6 = sand.u32 (!%p3103_p13), 1, %s2334_s17  }
  0xe6   : > { %571 = sbr.rel (%p3103_p13) target bundleno = 3000 (0xbb8), region = 76  ;;  %s2780_s4 = sshll.u32 (!%p3103_p13), %s3052_s6, 3 }
  0xe7   : > { %s574_s7 = scalar_lea.sflag (!%p3103_p13), [#allocation4], %s573_s27  ;;  %s577_s26 = scalar_lea.vmem (!%p3103_p13), [#allocation3], %s2780_s4 }
  0xe8   : > { %p3104_p9 = scmp.ne.s32.totalorder (!%p3103_p13), %s3084_s28, 0 }
  0xed   : > { %2293 = dma.done.wait (%p3104_p9), %s574_s7, 128  }
  0xee   : > { %2295 = vsyncadd (%p3104_p9), %s574_s7, 4294967168  ;;  %p3105_p5 = scmp.eq.s32.totalorder %s2506_s24, 0 }
  0xf0   : > { %2297 = dma.done.wait (%p3105_p5), [#allocation7], 256   ;;  %p3106_p1 = pmov %p3105_p5 }
  0xf2   : > { %2299 = vsyncadd (%p3106_p1), [#allocation7], 4294967040  ;;  %p3107_p3 = pmov %p3106_p1 }
  0xf3   : > { %p3108_p2 = pmov %p3106_p1 }
  0xf4   : > { %2301 = dma.done.wait (%p3107_p3), [#allocation10], 128  }
  0xf5   : > { %2303 = vsyncadd (%p3108_p2), [#allocation10], 4294967168  ;;  %s596_s25 = sand.u32 1, %s2322_s30   ;;  %p3109_p0 = scmp.ne.s32.totalorder %s3090_s14, 0 }
  0xf6   : > { %s2796_s5 = sshll.u32 %s596_s25, 4 }
  0xf7   : > { %2305 = dma.done.wait (%p3109_p0), %s574_s7, 256  }
  0xf8   : > { %2307 = vsyncadd (%p3109_p0), %s574_s7, 4294967040  ;;  %p3110_p10 = pmov %p3106_p1 }
  0xf9   : > { %p3111_p12 = pmov %p3106_p1 }
  0xfa   : > { %2309 = dma.done.wait (%p3110_p10), [#allocation7], 256  }
  0xfb   : > { %2311 = vsyncadd (%p3111_p12), [#allocation7], 4294967040  ;;  %p685_p6 = scmp.lt.s32.totalorder %s2342_s19, 1  ;;  %s3113_s13 = sld [smem:[#allocation34_spill]] }
  0xfc   : > { %s3114_s27 = sld [smem:[#allocation35_spill]]  ;;  %s3115_s28 = sld [smem:[#allocation36_spill]] }
  0xfd   : > { %s2809_s0 = scalar_select %p685_p6, %s2342_s19, 1 }
  0xfe   : > { %s3116_s21 = sld [smem:[#allocation37_spill]]  ;;  %s3117_s1 = sld [smem:[#allocation41_spill]] }
  0xff   : > { %s1765_s22 = sshll.u32 %s2809_s0, 4  ;;  %s1769_s29 = sshll.u32 %s2809_s0, 5 }
 0x100   : > { %s3118_s20 = sld [smem:[#allocation40_spill]]  ;;  %s684_s9 = scalar_lea.vmem [#allocation13], %s2780_s4 }
 0x101   : > { %s689_s16 = scalar_lea.vmem %s3113_s13, %s1765_s22  ;;  %p1729_p7 = scmp.ne.s32.totalorder %s2342_s19, 0 }
 0x102   : > { %s2822_s7 = scalar_lea.vmem %s3114_s27, %s1765_s22  ;;  %s2827_s3 = scalar_lea.vmem %s3115_s28, %s1765_s22  ;;  %v723_v0 = vld [vmem:[%s577_s26] sm:$0xff] (!%p1729_p7)  ;;  %vm724_vm0 = vcmask (!%p1729_p7), 261120  }
 0x103   : > { %722 = sbr.rel (%p1729_p7) target bundleno = 266 (0x10a), region = 104  ;;  %725 = vst.msk [vmem:[#allocation2] sm:$0xff] (!%p1729_p7), %vm724_vm0, %v723_v0 }
 0x104   : > { %s2832_s18 = scalar_lea.vmem %s3116_s21, %s1765_s22  ;;  %s2838_s2 = scalar_lea.vmem %s3117_s1, %s1765_s22 }
 0x106   : > { %s2843_s27 = scalar_lea.vmem %s3118_s20, %s1769_s29 }
 0x10a PF: > { %v2024_v1 = vld [vmem:[%s689_s16] sm:$0xff]   ;;  %v2368_v2 = vmov 0.0   ;;  %v2025_v3 = vld [vmem:[%s689_s16 + $0x8] sm:$0xff]   ;;  %vm2369_vm1 = vmmov 0   ;;  %v727_v5 = vld [vmem:[#allocation6] sm:$0xff]  ;;  %s2370_s8 = smov 16   ;;  %v738_v10 = vlaneseq }
 0x10b   : > { %1798 = vmatprep.subr.bf16.mxu1 %v2368_v2  ;;  %1814 = vmatprep.subr.bf16.mxu0 %v2368_v2  ;;  %v2851_v4 = vld [vmem:[#allocation2] sm:$0xff]  ;;  %vm754_vm2 = vcmask 261120   ;;  %v2027_v9 = vld [vmem:[%s2822_s7 + $0x8] sm:$0xff]   ;;  %s2371_s12 = smov 112   ;;  %vm944_vm3 = vcmask 130048   ;;  %vm1042_vm5 = vcmask 64512  }
 0x10c   : > { %1799 = vmatpush3.bf16.msra.mxu1 %v2024_v1  ;;  %1802 = vmatprep.mubr.msk.bf16.mxu1 %vm2369_vm1, %v2368_v2  ;;  %v2858_v6 = vpack.c.bf16 %v2851_v4, %v2851_v4  ;;  %v2026_v7 = vld [vmem:[%s2822_s7] sm:$0xff]   ;;  %v2875_v11 = vshrl.u32 %v738_v10, 7  ;;  %v2029_v50 = vld [vmem:[%s2827_s3 + $0x8] sm:$0xff]   ;;  %s3121_s26 = sld [smem:[#allocation39_spill]]  ;;  %vm1321_vm6 = vcmask 523264   ;;  %p1755_p11 = scmp.ne.s32.totalorder %s2342_s19, 1 }
 0x10d   : > { %1800 = vmatprep.subr.bf16.mxu1 %v2368_v2  ;;  %1818 = vmatprep.mubr.msk.bf16.mxu0 %vm2369_vm1, %v2368_v2  ;;  %v728_v8 = vld [vmem:[#allocation8] sm:$0xff]  ;;  %v729_v51 = vld [vmem:[#allocation9] sm:$0xff]  ;;  %vm2373_vm7 = vmmov (!%p1755_p11), 0   ;;  %s3123_s22 = sld [smem:[#allocation43_spill]] (!%p1755_p11) }
 0x10e   : > { %931 = vrot.lane.b32.xlu0 %v727_v5, %s2370_s8  ;;  %v804_v14 = vsub.s32 1, %v2875_v11  ;;  %v740_v16 = vsub.s32 0, %v2875_v11  ;;  %v2880_v19 = vld [vmem:[%s2838_s2] sm:$0xff]  ;;  %vm730_vm4 = vcmp.eq.f32.partialorder %v729_v51, 0.0  ;;  %v864_v61 = vsub.s32 2, %v2875_v11  ;;  %v2031_v10 = vld [vmem:[%s2832_s18 + $0x8] sm:$0xff]  }
 0x10f   : > { %v2028_v49 = vld [vmem:[%s2827_s3] sm:$0xff]   ;;  %s3119_s3 = scalar_lea.vmem [#allocation11], %s2796_s5 }
 0x110   : > { %1801 = vmatpush3.bf16.msra.mxu1 %v2025_v3  ;;  %v805_v20 = vrot.slane %v2880_v19, %v804_v14  ;;  %v741_v21 = vrot.slane %v2880_v19, %v740_v16  ;;  %1815 = vmatpush3.bf16.msra.mxu0 %v2028_v49  ;;  %v865_v0 = vrot.slane %v2880_v19, %v864_v61 }
 0x111   : > { %1806 = vmatprep.subr.bf16.mxu1 %v2368_v2  ;;  %1816 = vmatprep.subr.bf16.mxu0 %v2368_v2 }
 0x112   : > { %920 = vrot.lane.b32.xlu0 %v728_v8, %s2370_s8  ;;  %s3122_s5 = scalar_lea.vmem %s3121_s26, %s2809_s0 }
 0x113   : > { %1803 = vmatmul.mubr.msk.bf16.vlgmr.msra.gmra.mrb[0].mxu1 %vm754_vm2, %v2858_v6 }
 0x114   : > { %1807 = vmatpush3.bf16.msra.mxu1 %v2026_v7  ;;  %1810 = vmatprep.mubr.msk.bf16.mxu1 %vm2369_vm1, %v2368_v2 }
 0x115   : > { %1808 = vmatprep.subr.bf16.mxu1 %v2368_v2  ;;  %1817 = vmatpush3.bf16.msra.mxu0 %v2029_v50 }
 0x116   : > { %1832 = vmatprep.subr.bf16.mxu0 %v2368_v2 }
 0x118   : > { %1809 = vmatpush3.bf16.msra.mxu1 %v2027_v9  ;;  %1819 = vmatmul.mubr.msk.bf16.vlgmr.msra.gmra.mrb[0].mxu0 %vm754_vm2, %v2858_v6 }
 0x119   : > { %1822 = vmatprep.subr.mxu1 %v2368_v2  ;;  %1836 = vmatprep.mubr.msk.bf16.mxu0 %vm2369_vm1, %v2368_v2 }
 0x11b   : > { %1811 = vmatmul.mubr.msk.bf16.vlgmr.msra.gmra.mrb[4].mxu1 %vm754_vm2, %v2858_v6  ;;  %v2030_v6 = vld [vmem:[%s2832_s18] sm:$0xff]   ;;  %s3120_s18 = smov %s3119_s3 }
 0x11c   : > { %1824 = vmatprep.mubr.msk.f32.mxu1 %vm2369_vm1, %v2368_v2  ;;  %1833 = vmatpush3.bf16.msra.mxu0 %v2030_v6 }
 0x11d   : > { %1834 = vmatprep.subr.bf16.mxu0 %v2368_v2 }
 0x120   : > { %1835 = vmatpush3.bf16.msra.mxu0 %v2031_v10 }
 0x121   : > { %1848 = vmatprep.subr.bf16.mxu0 %v2368_v2 }
 0x180   : > { %v932_v18 = vpop.permute.xlu0 %931 }
 0x184   : > { %v921_v25 = vpop.permute.xlu0 %920 }
 0x1e6   : > { %v792_v12 = vpop.f32.mrb[0].mxu1 }
 0x1e7   : > { %v1804_v13 = vpop.f32.mrb[1].mxu1  ;;  %v793_v27 = vadd.f32 %v792_v12, %v741_v21 }
 0x1e8   : > { %v795_v15 = vpop.f32.mrb[2].mxu1 }
 0x1e9   : > { %v1805_v17 = vpop.f32.mrb[3].mxu1  ;;  %v923_v31 = vmul.f32 %v921_v25, %v793_v27  ;;  %v934_v32 = vmul.f32 %v932_v18, %v793_v27  ;;  %v929_v36 = vmul.f32 %v793_v27, %v728_v8  ;;  %v918_v44 = vmul.f32 %v793_v27, %v727_v5 }
 0x1ea   : > { %v1134_v15 = vsub.s32 3, %v2875_v11 }
 0x1eb   : > { %v912_v62 = vpop.f32.mrb[0].mxu0 }
 0x1ec   : > { %v1820_v63 = vpop.f32.mrb[1].mxu0  ;;  %v1135_v16 = vrot.slane %v2880_v19, %v1134_v15 }
 0x1ed   : > { %v915_v1 = vpop.f32.mrb[2].mxu0 }
 0x1ee   : > { %v852_v22 = vpop.f32.mrb[4].mxu1  ;;  %v1821_v3 = vpop.f32.mrb[3].mxu0 }
 0x1ef   : > { %v853_v23 = vadd.f32 %v852_v22, %v805_v20  ;;  %v1812_v24 = vpop.f32.mrb[5].mxu1 }
 0x1f0   : > { %v855_v26 = vpop.f32.mrb[6].mxu1 }
 0x1f1   : > { %v1813_v28 = vpop.f32.mrb[7].mxu1  ;;  %v954_v29 = vmul.f32 %v932_v18, %v853_v23  ;;  %v947_v30 = vmul.f32 %v921_v25, %v853_v23  ;;  %v953_v33 = vmul.f32 %v853_v23, %v728_v8  ;;  %v946_v40 = vmul.f32 %v853_v23, %v727_v5 }
 0x1f2   : > { %v913_v5 = vadd.f32 %v912_v62, %v865_v0 }
 0x1f3   : > { %956 = vrot.lane.b32.xlu1 %v954_v29, %s2371_s12  ;;  %949 = vrot.lane.b32.xlu0 %v947_v30, %s2371_s12  ;;  %v2032_v30 = vld [vmem:[%s3119_s3] sm:$0xff]  }
 0x1f7   : > { %936 = vrot.lane.b32.xlu1 %v934_v32, %s2371_s12  ;;  %925 = vrot.lane.b32.xlu0 %v923_v31, %s2371_s12  ;;  %v2033_v31 = vld [vmem:[%s3120_s18 + $0x8] sm:$0xff]  }
 0x1f8   : > { %v2035_v32 = vld [vmem:[%s2843_s27 + $0x8] sm:$0xff]  }
 0x265   : > { %v957_v34 = vpop.permute.xlu1 %956  ;;  %v950_v39 = vpop.permute.xlu0 %949 }
 0x266   : > { %v959_v35 = vadd.f32 %v957_v34, %v953_v33  ;;  %v952_v41 = vsub.f32 %v946_v40, %v950_v39 }
 0x268   : > { %961 = vrot.lane.b32.xlu1 %v959_v35, %s2370_s8 }
 0x269   : > { %v937_v37 = vpop.permute.xlu1 %936  ;;  %v926_v42 = vpop.permute.xlu0 %925 }
 0x26a   : > { %v939_v38 = vadd.f32 %v937_v37, %v929_v36  ;;  %v928_v46 = vsub.f32 %v918_v44, %v926_v42  ;;  %v1208_v36 = vsub.s32 5, %v2875_v11  ;;  %v1213_v37 = vsub.s32 6, %v2875_v11 }
 0x26c   : > { %941 = vrot.lane.b32.xlu1 %v939_v38, %s2370_s8  ;;  %v1209_v38 = vrot.slane %v2880_v19, %v1208_v36 }
 0x2da   : > { %v962_v43 = vpop.permute.xlu1 %961 }
 0x2db   : > { %v964_v45 = vsel %vm944_vm3, %v952_v41, %v962_v43  ;;  %v1214_v41 = vrot.slane %v2880_v19, %v1213_v37 }
 0x2dc   : > { %1823 = vmatpush3.xpose.msk.msra.mxu1 %vm754_vm2, %v964_v45  ;;  %v2036_v45 = vld [vmem:[%s2843_s27 + $0x10] sm:$0xff]  }
 0x2dd   : > { %1827 = vmatprep.subr.mxu1 %v2368_v2 }
 0x2de   : > { %v942_v47 = vpop.permute.xlu1 %941 }
 0x2df   : > { %v945_v48 = vsel %vm944_vm3, %v928_v46, %v942_v47  ;;  %v2037_v46 = vld [vmem:[%s2843_s27 + $0x18] sm:$0xff]   ;;  %v1745_v47 = vld [vmem:[%s3122_s5] ss:$0 sm:$0xff] }
 0x2e0   : > { %1825 = vmatmul.mubr.msk.f32.vlgmr.msra.gmra.mrb[8].mxu1 %vm754_vm2, %v945_v48 }
 0x2e1   : > { %1829 = vmatprep.mubr.msk.f32.mxu1 %vm2369_vm1, %v2368_v2  ;;  %1828 = vmatpush3.msra.mxu1 %v913_v5 }
 0x2e2   : > { %1840 = vmatprep.subr.bf16.mxu1 %v2368_v2 }
 0x3b3   : > { %v1037_v52 = vpop.f32.mrb[8].mxu1 }
 0x3b4   : > { %v1041_v53 = vsel %vm730_vm4, -1e+09, %v1037_v52  ;;  %v1826_v54 = vpop.f32.mrb[9].mxu1 }
 0x3b5   : > { %v1043_v55 = vsel %vm1042_vm5, %v1041_v53, -inf }
 0x3b6   : > { %1044 = vmax.xlane.f32.xlu0 %v1043_v55  ;;  %v1295_v55 = vsub.s32 4, %v2875_v11 }
 0x443   : > { %v1045_v56 = vpop.xlane.xlu0 %1044 }
 0x444   : > { %v1046_v57 = vsub.f32 %v1041_v53, %v1045_v56 }
 0x446   : > { %v1047_v58 = vmul.f32 1.442695, %v1046_v57 }
 0x448   : > { %2038 = vpow2.f32 %v1047_v58 }
 0x452   : > { %v2039_v59 = vpop.eup %2038 }
 0x453   : > { %v1049_v60 = vsel %vm1042_vm5, %v2039_v59, 0.0 }
 0x454   : > { %1050 = vadd.xlane.f32.xlu1 %v1049_v60 }
 0x4e1   : > { %v1051_v7 = vpop.xlane.xlu1 %1050 }
 0x4e2   : > { %2040 = vrcp.f32 %v1051_v7 }
 0x4ec   : > { %v2041_v8 = vpop.eup %2040 }
 0x4ed   : > { %v1053_v9 = vmul.f32 %v2041_v8, %v2039_v59 }
 0x4ef   : > { %1830 = vmatmul.mubr.msk.f32.vlgmr.msra.gmra.mrb[10].mxu1 %vm1042_vm5, %v1053_v9  ;;  %v1381_v9 = vsub.s32 7, %v2875_v11 }
 0x4f0   : > { %1844 = vmatprep.mubr.msk.bf16.mxu1 %vm2369_vm1, %v2368_v2  ;;  %1841 = vmatpush3.bf16.msra.mxu1 %v2032_v30 }
 0x4f1   : > { %1842 = vmatprep.subr.bf16.mxu1 %v2368_v2  ;;  %v1382_v10 = vrot.slane %v2880_v19, %v1381_v9 }
 0x4f4   : > { %1843 = vmatpush3.bf16.msra.mxu1 %v2033_v31 }
 0x5c2   : > { %v1123_v12 = vpop.f32.mrb[10].mxu1 }
 0x5c3   : > { %v1127_v13 = vpack.c.bf16 %v1123_v12, %v1123_v12  ;;  %v1831_v14 = vpop.f32.mrb[11].mxu1 }
 0x5c4   : > { %v1754_v14 = vld [vmem:[%s2838_s2 + $0x8] ss:$0 sm:$0xff] }
 0x5c5   : > { %1837 = vmatmul.mubr.msk.bf16.vlgmr.msra.gmra.mrb[4].mxu0 %vm754_vm2, %v1127_v13 }
 0x5c6   : > { %1856 = vmatprep.mubr.msk.bf16.mxu0 %vm2369_vm1, %v2368_v2 }
 0x698   : > { %v1185_v17 = vpop.f32.mrb[4].mxu0 }
 0x699   : > { %v1186_v18 = vadd.f32 %v1185_v17, %v1135_v16  ;;  %v1838_v20 = vpop.f32.mrb[5].mxu0  ;;  %v2046_v17 = vld [vmem:[#allocation12] sm:$0xff] (!%p1755_p11)  }
 0x69a   : > { %v1188_v21 = vpop.f32.mrb[6].mxu0  ;;  %v2047_v20 = vld [vmem:[#allocation12 + $0x8] sm:$0xff] (!%p1755_p11)  }
 0x69b   : > { %v1839_v22 = vpop.f32.mrb[7].mxu0  ;;  %v1191_v23 = vadd.f32 %v1186_v18, %v2851_v4  ;;  %v2034_v4 = vld [vmem:[%s2843_s27] sm:$0xff]   ;;  %v2372_v18 = vmov (!%p1755_p11), 0.0  }
 0x69c   : > { %1849 = vmatpush3.bf16.msra.mxu0 %v2034_v4 }
 0x69d   : > { %v1192_v24 = vsel %vm754_vm2, %v1191_v23, 0.0  ;;  %1850 = vmatprep.subr.bf16.mxu0 %v2368_v2 }
 0x69e   : > { %1193 = vadd.xlane.f32.xlu0 %v1192_v24 }
 0x6a0   : > { %1851 = vmatpush3.bf16.msra.mxu0 %v2035_v32 }
 0x6a1   : > { %1852 = vmatprep.subr.bf16.mxu0 %v2368_v2 }
 0x6a4   : > { %1853 = vmatpush3.bf16.msra.mxu0 %v2036_v45 }
 0x6a5   : > { %1854 = vmatprep.subr.bf16.mxu0 %v2368_v2  ;;  %v1296_v2 = vrot.slane %v2880_v19, %v1295_v55  ;;  %v1756_v19 = vld [vmem:[%s3123_s22] ss:$0 sm:$0xff] (!%p1755_p11) }
 0x6a8   : > { %1855 = vmatpush3.bf16.msra.mxu0 %v2037_v46 }
 0x6a9   : > { %1860 = vmatprep.subr.bf16.mxu0 (!%p1755_p11), %v2372_v18 }
 0x72b   : > { %v1194_v25 = vpop.xlane.xlu0 %1193 }
 0x72c   : > { %v1196_v26 = vmul.f32 0.03125, %v1194_v25 }
 0x72e   : > { %v1197_v27 = vsub.f32 %v1191_v23, %v1196_v26 }
 0x730   : > { %v1198_v28 = vmul.f32 %v1197_v27, %v1197_v27 }
 0x732   : > { %v1199_v29 = vsel %vm754_vm2, %v1198_v28, 0.0 }
 0x733   : > { %1200 = vadd.xlane.f32.xlu0 %v1199_v29 }
 0x7c0   : > { %v1201_v33 = vpop.xlane.xlu0 %1200 }
 0x7c1   : > { %v1202_v34 = vmul.f32 0.03125, %v1201_v33 }
 0x7c3   : > { %v1203_v35 = vadd.f32 1e-05, %v1202_v34 }
 0x7c5   : > { %2042 = vrsqrt.f32 %v1203_v35 }
 0x7cf   : > { %v2043_v39 = vpop.eup %2042 }
 0x7d0   : > { %v1205_v40 = vmul.f32 %v2043_v39, %v1197_v27 }
 0x7d2   : > { %v1210_v42 = vmul.f32 %v1209_v38, %v1205_v40 }
 0x7d4   : > { %v1215_v43 = vadd.f32 %v1214_v41, %v1210_v42 }
 0x7d6   : > { %v1216_v44 = vpack.c.bf16 %v1215_v43, %v1215_v43 }
 0x7d8   : > { %1845 = vmatmul.mubr.msk.bf16.vlgmr.msra.gmra.mrb[12].mxu1 %vm754_vm2, %v1216_v44 }
 0x8ab   : > { %v1277_v48 = vpop.f32.mrb[12].mxu1 }
 0x8ac   : > { %v1278_v49 = vadd.f32 %v1745_v47, %v1277_v48  ;;  %v1846_v50 = vpop.f32.mrb[13].mxu1 }
 0x8ad   : > { %v1280_v51 = vpop.f32.mrb[14].mxu1 }
 0x8ae   : > { %v1283_v52 = vmax.f32 %v1278_v49, 0.0  ;;  %v1847_v53 = vpop.f32.mrb[15].mxu1 }
 0x8b0   : > { %v1284_v54 = vpack.c.bf16 %v1283_v52, %v1283_v52 }
 0x8b2   : > { %1857 = vmatmul.mubr.msk.bf16.vlgmr.msra.gmra.mrb[8].mxu0 %vm1321_vm6, %v1284_v54 }
 0x8b3   : > { %1861 = vmatpush3.bf16.msra.mxu0 (!%p1755_p11), %v2046_v17  ;;  %1864 = vmatprep.mubr.msk.bf16.mxu0 (!%p1755_p11), %vm2373_vm7, %v2372_v18 }
 0x8b4   : > { %1862 = vmatprep.subr.bf16.mxu0 (!%p1755_p11), %v2372_v18 }
 0x8b7   : > { %1863 = vmatpush3.bf16.msra.mxu0 (!%p1755_p11), %v2047_v20 }
 0x985   : > { %v1359_v56 = vpop.f32.mrb[8].mxu0 }
 0x986   : > { %v1360_v57 = vadd.f32 %v1359_v56, %v1296_v2  ;;  %v1858_v58 = vpop.f32.mrb[9].mxu0 }
 0x987   : > { %v1362_v59 = vpop.f32.mrb[10].mxu0 }
 0x988   : > { %v1859_v60 = vpop.f32.mrb[11].mxu0  ;;  %v1365_v61 = vadd.f32 %v1360_v57, %v1215_v43 }
 0x98a   : > { %v1366_v62 = vsel %vm754_vm2, %v1365_v61, 0.0 }
 0x98b   : > { %1367 = vadd.xlane.f32.xlu1 %v1366_v62 }
 0xa18   : > { %v1368_v63 = vpop.xlane.xlu1 %1367 }
 0xa19   : > { %v1369_v0 = vmul.f32 0.03125, %v1368_v63 }
 0xa1b   : > { %v1370_v1 = vsub.f32 %v1365_v61, %v1369_v0 }
 0xa1d   : > { %v1371_v3 = vmul.f32 %v1370_v1, %v1370_v1 }
 0xa1f   : > { %v1372_v5 = vsel %vm754_vm2, %v1371_v3, 0.0 }
 0xa20   : > { %1373 = vadd.xlane.f32.xlu0 %v1372_v5 }
 0xaad   : > { %v1374_v6 = vpop.xlane.xlu0 %1373 }
 0xaae   : > { %v1375_v7 = vmul.f32 0.03125, %v1374_v6 }
 0xab0   : > { %v1376_v8 = vadd.f32 1e-05, %v1375_v7 }
 0xab2   : > { %2044 = vrsqrt.f32 %v1376_v8 }
 0xabc   : > { %v2045_v12 = vpop.eup %2044 }
 0xabd   : > { %v1378_v13 = vmul.f32 %v2045_v12, %v1370_v1  ;;  %1393 = sbr.rel (%p1755_p11) target bundleno = 2972 (0xb9c), region = 108 }
 0xabf   : > { %v1383_v15 = vmul.f32 %v1382_v10, %v1378_v13 }
 0xac1   : > { %v1388_v16 = vadd.f32 %v1754_v14, %v1383_v15 }
 0xac3   : > { %1389 = vst.msk [vmem:[#allocation2] sm:$0xff] %vm754_vm2, %v1388_v16  ;;  %v1394_v11 = vpack.c.bf16 (!%p1755_p11), %v1388_v16, %v1388_v16 }
 0xac5   : > { %1865 = vmatmul.mubr.msk.bf16.vlgmr.msra.gmra.mrb[0].mxu0 %vm754_vm2, %v1394_v11 }
 0xb98   : > { %v1455_v21 = vpop.f32.mrb[0].mxu0 }
 0xb99   : > { %v1456_v22 = vadd.f32 %v1756_v19, %v1455_v21  ;;  %v1866_v23 = vpop.f32.mrb[1].mxu0 }
 0xb9a   : > { %v1458_v24 = vpop.f32.mrb[2].mxu0 }
 0xb9b   : > { %1461 = vst [vmem:[%s684_s9] sm:$0xff] %v1456_v22  ;;  %v1867_v25 = vpop.f32.mrb[3].mxu0 }
 0xb9c PF: > { %s3124_s19 = sld [smem:[#allocation22_spill]]  ;;  %s3125_s29 = sld [smem:[#allocation44_spill]] }
 0xb9d   : > { %s1476_s1 = sshll.u32 %s684_s9, 4  ;;  %s3127_s2 = sand.u32 1, %s2334_s17   ;;  %s1477_s1 = int_to_ptr.vmem [resolvable:$true] %s1476_s1 }
 0xb9e   : > { %s1463_s13 = scalar_lea.sflag [#allocation5], %s3127_s2  ;;  %s2220_s24 = scalar_lea.vmem %s1477_s1, 128 }
 0xb9f   : > { %p2221_p8 = scmp.ne.s32.totalorder %s1477_s1, %s2220_s24  ;;  %p3128_p4 = scmp.ne.s32.totalorder %s3092_s10, 0 }
 0xba0   : > { %s2374_s20 = smov [#allocation13]  }
 0xba1   : > { %p2222_p13 = pnand %p2221_p8, %p3128_p4  ;;  %s2224_s27 = sshll.u32 %s2374_s20, 4  ;;  %s2225_s27 = int_to_ptr.vmem [resolvable:$false] %s2224_s27 }
 0xba2   : > { %s1761_s16 = sshll.u32 %s3124_s19, 7  ;;  %s3126_s14 = smov %s3125_s29 }
 0xba3   : > { %s2960_s23 = scalar_lea.hbm %s3125_s29, %s1761_s16  ;;  %p2223_p9 = pneg %p2222_p13 }
 0xba4   : > { %s2226_s8 = scalar_lea.vmem %s2225_s27, 256  ;;  %p2227_p5 = scmp.lt.s32.totalorder %s1477_s1, %s2225_s27 }
 0xba5   : > { %p2228_p1 = scmp.lt.s32.totalorder %s2226_s8, %s2220_s24 }
 0xba7   : > { %p2229_p3 = por %p2228_p1, %p2227_p5 }
 0xba9   : > { %p2230_p2 = pnand %p2229_p3, %p2223_p9 }
 0xbab   : > { %2233 = shalt.err (!%p2230_p2)
}
 0xbac   : > { %s2234_s4 = scalar_lea.hbm %s2960_s23, 128  ;;  %s2238_s3 = scalar_lea.hbm %s3126_s14, 256 }
 0xbad   : > { %p2235_p0 = scmp.ne.s32.totalorder %s2960_s23, %s2234_s4  ;;  %p2239_p6 = scmp.lt.u32.totalorder %s2960_s23, %s3126_s14 }
 0xbae   : > { %p2240_p7 = scmp.lt.u32.totalorder %s2238_s3, %s2234_s4  ;;  %p2242_p8 = scmp.lt.u32.totalorder %s2234_s4, %s2960_s23 }
 0xbaf   : > { %p2236_p10 = pnand %p2235_p0, %p3128_p4 }
 0xbb0   : > { %p2241_p11 = por %p2240_p7, %p2239_p6 }
 0xbb1   : > { %p2237_p12 = pneg %p2236_p10 }
 0xbb2   : > { %p2243_p13 = por %p2242_p8, %p2241_p11 }
 0xbb4   : > { %p2244_p9 = pnand %p2243_p13, %p2237_p12 }
 0xbb6   : > { %2247 = shalt.err (!%p2244_p9)
}
 0xbb7   : > { %1888 = dma.vmem_to_hbm [thread:$0]  (%p3128_p4), %s1477_s1, 128, %s2960_s23, %s1463_s13  }
 0xbb8 PF: > { %s3129_s6 = sld [smem:[#allocation25_spill]]  ;;  %s3130_s26 = sld [smem:[#allocation20_spill]] }
 0xbb9   : > { %p3131_p1 = scmp.ne.s32.totalorder %s3094_s11, 0 }
 0xbbe   : > { %p1923_p5 = scmp.ge.s32.totalorder %s3129_s6, 2  ;;  %s1488_s5 = sand.u32 1, %s3130_s26  }
 0xbbf   : > { %s1489_s28 = scalar_lea.sflag [#allocation5], %s1488_s5 }
 0xbc0   : > { %p1911_p3 = pnand %p1923_p5, %p3131_p1 }
 0xbc2   : > { %2313 = dma.done.wait (!%p1911_p3), %s1489_s28, 128  }
 0xbc3   : > { %2315 = vsyncadd (!%p1911_p3), %s1489_s28, 4294967168  ;;  %s32_s23 = sadd.s32 1, %s3129_s6   ;;  %s3132_s0 = sld [smem:[#allocation28_spill]] }
 0xbc4   : > { %p29_p2 = scmp.ge.s32.totalorder %s32_s23, 6   ;;  %s3133_s10 = sld [smem:[#allocation21_spill]] }
 0xbc5   : > { %s3134_s18 = sld [smem:[#allocation29_spill]]  ;;  %s3135_s19 = sld [smem:[#allocation23_spill]] }
 0xbc6   : > { %s3136_s20 = sld [smem:[#allocation24_spill]]  ;;  %s3137_s21 = sld [smem:[#allocation26_spill]] }
 0xbc7   : > { %s3138_s22 = sld [smem:[#allocation27_spill]]  ;;  %s3139_s29 = smov %s2322_s30 }
 0xbc8   : > { %s3140_s30 = smov %s2326_s15  ;;  %s3142_s16 = smov %s2334_s17 }
 0xbc9   : > { %s3141_s15 = smov %s3132_s0  ;;  %31 = sbr.rel (!%p29_p2) target bundleno = 27 (0x1b), region = 177 }
 0xbca   : > { %s3143_s17 = smov %s3133_s10 }
 0xbd0   :  { %1494 = vsyncpa [#allocation4], 1 }
 0xbd1   :  { %1496 = vsyncpa [#allocation4 + $0x1], 1 }
 0xbd2   :  { %1497 = vsyncpa [#allocation7], 1 }
 0xbd3   :  { %1498 = vsyncpa [#allocation10], 1 }
 0xbd4   :  { %1499 = vsyncpa [#allocation5], 1 }
 0xbd5   :  { %1501 = vsyncpa [#allocation5 + $0x1], 1 }

</bundles_post_ra>
